<compile_context>
chip_gen: v6e
topology: v6e:2x2x1
jax: 0.10.0
libtpu: 0.0.40
codegen_flags: <defaults>
</compile_context>

<pallas_src>
import jax
import jax.numpy as jnp
from jax.experimental import pallas as pl
from jax.experimental.pallas import tpu as pltpu

IN_F = 2048
HID = 512
OUT_F = 2
OUT_PAD = 128  # fc2 weight padded to 128 lanes so the second matmul is MXU/lane friendly


def mlp_kernel(x_ref, w1_ref, b1_ref, w2_ref, b2_ref, o_ref):
    # Cast x to bf16 on the VPU (hidden under the MXU); no-op if x is already bf16.
    x = x_ref[...].astype(jnp.bfloat16)
    # fc1: [TB, 2048](bf16) @ [2048, 512](bf16) -> f32 accumulate on the MXU.
    h = jnp.dot(x, w1_ref[...], preferred_element_type=jnp.float32)
    h = jnp.maximum(h + b1_ref[...], 0.0)
    # fc2: [TB, 512](bf16) @ [512, 128](bf16, zero-padded lanes) -> f32 accumulate.
    out = jnp.dot(h.astype(jnp.bfloat16), w2_ref[...],
                  preferred_element_type=jnp.float32)
    # Store only the 2 real logit columns (tiny masked store; saves ~10% kernel HBM traffic).
    o_ref[...] = (out[:, :OUT_F] + b2_ref[...]).astype(o_ref.dtype)


def _pick_tile_b(B):
    # Small batches: round up to the bf16 sublane multiple instead of padding to 256.
    if B <= 256:
        return max(16, ((B + 15) // 16) * 16)
    # Large batches: 256 rows fill the v6e/v7x 256x256 MXU and amortize per-step overhead
    # (also a multiple of 128 for v5e's 128x128 MXU).
    return 256


def new_classifier_forward(x, w1_t, b1, w2_t_pad, b2, *, tile_b=None):
    """x: [B, 2048] (f32 or bf16). Params as produced by init_params. Returns [B, 2] f32."""
    B = x.shape[0]
    if tile_b is None:
        tile_b = _pick_tile_b(B)

    # Pad the batch to a multiple of tile_b so every block is (tile_b, ...). Padded rows
    # produce bias-only values that are sliced off below.
    b_pad = pl.cdiv(B, tile_b) * tile_b
    if b_pad != B:
        x = jnp.pad(x, ((0, b_pad - B), (0, 0)))

    grid = (b_pad // tile_b,)
    vmem = pltpu.MemorySpace.VMEM

    flops = 2 * b_pad * (IN_F * HID + HID * OUT_PAD)
    bytes_accessed = (
        x.size * x.dtype.itemsize
        + w1_t.size * w1_t.dtype.itemsize
        + b1.size * b1.dtype.itemsize
        + w2_t_pad.size * w2_t_pad.dtype.itemsize
        + b2.size * b2.dtype.itemsize
        + b_pad * OUT_F * 4
    )

    out = pl.pallas_call(
        mlp_kernel,
        out_shape=jax.ShapeDtypeStruct((b_pad, OUT_F), jnp.float32),
        grid=grid,
        in_specs=[
            # x: one batch tile per grid step (software-pipelined DMA).
            pl.BlockSpec((tile_b, IN_F), lambda i: (i, 0), memory_space=vmem),
            # Weights / biases: constant index_map -> resident in VMEM across the grid.
            pl.BlockSpec((IN_F, HID), lambda i: (0, 0), memory_space=vmem),
            pl.BlockSpec((1, HID), lambda i: (0, 0), memory_space=vmem),
            pl.BlockSpec((HID, OUT_PAD), lambda i: (0, 0), memory_space=vmem),
            pl.BlockSpec((1, OUT_F), lambda i: (0, 0), memory_space=vmem),
        ],
        # Output block last dim (2) equals the full array dim -> legal narrow block.
        out_specs=pl.BlockSpec((tile_b, OUT_F), lambda i: (i, 0), memory_space=vmem),
        compiler_params=pltpu.CompilerParams(
            dimension_semantics=("parallel",),
        ),
        cost_estimate=pl.CostEstimate(
            flops=flops, transcendentals=0, bytes_accessed=bytes_accessed),
    )(x, w1_t, b1, w2_t_pad, b2)

    # Drop batch padding (cheap: [B, 2] slice of a [b_pad, 2] array).
    return out[:B]


def init_params(key):
    """Kaiming-normal init matching nn.init.kaiming_normal_ (fan_in, gain=sqrt(2)),
    biases zero (matches _init_weights). Weights stored transposed ([in, out]):
    fc1 weight bf16, fc2 weight bf16 zero-padded to 128 output lanes, fc2 bias [1, 2]."""
    k1, k2 = jax.random.split(key, 2)
    std1 = (2.0 / IN_F) ** 0.5
    std2 = (2.0 / HID) ** 0.5
    # PyTorch weight shape is [out, in]; store transposed [in, out] for the kernel.
    w1_t = (jax.random.normal(k1, (HID, IN_F), jnp.float32) * std1).T
    w2_t = (jax.random.normal(k2, (OUT_F, HID), jnp.float32) * std2).T
    b1 = jnp.zeros((1, HID), jnp.float32)

    w1_t = w1_t.astype(jnp.bfloat16)
    w2_t_pad = jnp.zeros((HID, OUT_PAD), jnp.bfloat16).at[:, :OUT_F].set(
        w2_t.astype(jnp.bfloat16))
    b2 = jnp.zeros((1, OUT_F), jnp.float32)
    return w1_t, b1, w2_t_pad, b2


def _reference(x, w1_t, b1, w2_t_pad, b2):
    """Pure-JAX reference using the same bf16-rounded operands as the kernel.
    (x and h are intentionally bf16-rounded before the MXU; logits differ from a pure-f32
    PyTorch forward only at the bf16 precision level.)"""
    xb = x.astype(jnp.bfloat16).astype(jnp.float32)
    w1f = w1_t.astype(jnp.float32)
    h = jnp.maximum(xb @ w1f + b1, 0.0).astype(jnp.bfloat16).astype(jnp.float32)
    out = h @ w2_t_pad.astype(jnp.float32)
    return out[:, :OUT_F] + b2


if __name__ == "__main__":
    key = jax.random.PRNGKey(0)
    k_x, k_p, k_x2 = jax.random.split(key, 3)

    w1_t, b1, w2_t_pad, b2 = init_params(k_p)

    # Small batch: tile_b snaps to 16 rows instead of padding to 128/256.
    B = 8
    x = jax.random.normal(k_x, (B, IN_F), jnp.float32)
    out = jax.block_until_ready(new_classifier_forward(x, w1_t, b1, w2_t_pad, b2))
    ref = _reference(x, w1_t, b1, w2_t_pad, b2)
    assert out.shape == (B, OUT_F)
    assert jnp.allclose(out, ref, atol=1e-2, rtol=1e-2)

    # Multi-tile batch: exercises the pipelined grid (tile_b=256), batch padding and the
    # "parallel" batch axis.
    B2 = 600
    x2 = jax.random.normal(k_x2, (B2, IN_F), jnp.float32)
    out2 = jax.block_until_ready(new_classifier_forward(x2, w1_t, b1, w2_t_pad, b2))
    ref2 = _reference(x2, w1_t, b1, w2_t_pad, b2)
    assert out2.shape == (B2, OUT_F)
    assert jnp.allclose(out2, ref2, atol=1e-2, rtol=1e-2)

    print("KERNEL_OK")
</pallas_src>

<mosaic_0001>
module attributes {stable_mosaic.version = 11 : i64} {
  func.func @mlp_kernel(%arg0: i32, %arg1: memref<16x2048xf32, #tpu.memory_space<vmem>>, %arg2: memref<2048x512xbf16, #tpu.memory_space<vmem>>, %arg3: memref<1x512xf32, #tpu.memory_space<vmem>>, %arg4: memref<512x128xbf16, #tpu.memory_space<vmem>>, %arg5: memref<1x2xf32, #tpu.memory_space<vmem>>, %arg6: memref<16x2xf32, #tpu.memory_space<vmem>>) attributes {dimension_semantics = [#tpu.dimension_semantics<parallel>], iteration_bounds = array<i64: 1>, scalar_prefetch = 0 : i64, scratch_operands = 0 : i64, tpu.core_type = #tpu.core_type<tc>, window_params = [{transform_indices = @transform_0, window_bounds = array<i64: 16, 2048>}, {pipeline_mode = #tpu.pipeline_mode<synchronous>, transform_indices = @transform_1, window_bounds = array<i64: 2048, 512>}, {pipeline_mode = #tpu.pipeline_mode<synchronous>, transform_indices = @transform_2, window_bounds = array<i64: 1, 512>}, {pipeline_mode = #tpu.pipeline_mode<synchronous>, transform_indices = @transform_3, window_bounds = array<i64: 512, 128>}, {pipeline_mode = #tpu.pipeline_mode<synchronous>, transform_indices = @transform_4, window_bounds = array<i64: 1, 2>}, {transform_indices = @transform_5, window_bounds = array<i64: 16, 2>}]} {
    %c0 = arith.constant 0 : index
    %c0_0 = arith.constant 0 : index
    %0 = vector.load %arg1[%c0, %c0_0] : memref<16x2048xf32, #tpu.memory_space<vmem>>, vector<16x2048xf32>
    %1 = arith.truncf %0 : vector<16x2048xf32> to vector<16x2048xbf16>
    %c0_1 = arith.constant 0 : index
    %c0_2 = arith.constant 0 : index
    %2 = vector.load %arg2[%c0_1, %c0_2] : memref<2048x512xbf16, #tpu.memory_space<vmem>>, vector<2048x512xbf16>
    %cst = arith.constant dense<0.000000e+00> : vector<16x512xf32>
    %3 = tpu.matmul %1, %2, %cst {dimension_numbers = #tpu.dot_dimension_numbers<[1], [0], [0], [1], [0, 0, 1, 1], [], []>} : vector<16x2048xbf16>, vector<2048x512xbf16>, vector<16x512xf32> -> vector<16x512xf32>
    %c0_3 = arith.constant 0 : index
    %c0_4 = arith.constant 0 : index
    %4 = vector.load %arg3[%c0_3, %c0_4] : memref<1x512xf32, #tpu.memory_space<vmem>>, vector<1x512xf32>
    %5 = vector.broadcast %4 : vector<1x512xf32> to vector<16x512xf32>
    %6 = arith.addf %3, %5 : vector<16x512xf32>
    %cst_5 = arith.constant 0.000000e+00 : f32
    %7 = vector.broadcast %cst_5 : f32 to vector<16x512xf32>
    %8 = arith.maximumf %6, %7 : vector<16x512xf32>
    %9 = arith.truncf %8 : vector<16x512xf32> to vector<16x512xbf16>
    %c0_6 = arith.constant 0 : index
    %c0_7 = arith.constant 0 : index
    %10 = vector.load %arg4[%c0_6, %c0_7] : memref<512x128xbf16, #tpu.memory_space<vmem>>, vector<512x128xbf16>
    %cst_8 = arith.constant dense<0.000000e+00> : vector<16x128xf32>
    %11 = tpu.matmul %9, %10, %cst_8 {dimension_numbers = #tpu.dot_dimension_numbers<[1], [0], [0], [1], [0, 0, 1, 1], [], []>} : vector<16x512xbf16>, vector<512x128xbf16>, vector<16x128xf32> -> vector<16x128xf32>
    %12 = vector.extract_strided_slice %11 {offsets = [0, 0], sizes = [16, 2], strides = [1, 1]} : vector<16x128xf32> to vector<16x2xf32>
    %c0_9 = arith.constant 0 : index
    %c0_10 = arith.constant 0 : index
    %13 = vector.load %arg5[%c0_9, %c0_10] : memref<1x2xf32, #tpu.memory_space<vmem>>, vector<1x2xf32>
    %14 = vector.broadcast %13 : vector<1x2xf32> to vector<16x2xf32>
    %15 = arith.addf %12, %14 : vector<16x2xf32>
    %c0_11 = arith.constant 0 : index
    %c0_12 = arith.constant 0 : index
    %16 = vector.load %arg6[%c0_11, %c0_12] : memref<16x2xf32, #tpu.memory_space<vmem>>, vector<16x2xf32>
    tpu.vector_store %arg6[%c0_11, %c0_12], %15 {strides = array<i32>} : memref<16x2xf32, #tpu.memory_space<vmem>>, vector<16x2xf32>,
    return
  }
  func.func @transform_0(%arg0: i32) -> (i32, i32) {
    %c0_i32 = arith.constant 0 : i32
    %c0_i32_0 = arith.constant 0 : i32
    return %arg0, %c0_i32 : i32, i32
  }
  func.func @transform_1(%arg0: i32) -> (i32, i32) {
    %c0_i32 = arith.constant 0 : i32
    %c0_i32_0 = arith.constant 0 : i32
    %c0_i32_1 = arith.constant 0 : i32
    return %c0_i32, %c0_i32_0 : i32, i32
  }
  func.func @transform_2(%arg0: i32) -> (i32, i32) {
    %c0_i32 = arith.constant 0 : i32
    %c0_i32_0 = arith.constant 0 : i32
    %c0_i32_1 = arith.constant 0 : i32
    return %c0_i32, %c0_i32_0 : i32, i32
  }
  func.func @transform_3(%arg0: i32) -> (i32, i32) {
    %c0_i32 = arith.constant 0 : i32
    %c0_i32_0 = arith.constant 0 : i32
    %c0_i32_1 = arith.constant 0 : i32
    return %c0_i32, %c0_i32_0 : i32, i32
  }
  func.func @transform_4(%arg0: i32) -> (i32, i32) {
    %c0_i32 = arith.constant 0 : i32
    %c0_i32_0 = arith.constant 0 : i32
    %c0_i32_1 = arith.constant 0 : i32
    return %c0_i32, %c0_i32_0 : i32, i32
  }
  func.func @transform_5(%arg0: i32) -> (i32, i32) {
    %c0_i32 = arith.constant 0 : i32
    %c0_i32_0 = arith.constant 0 : i32
    return %arg0, %c0_i32 : i32, i32
  }
}

</mosaic_0001>

<bundles_post_ra>
// kernel: tpu_custom_call.1
= control target key start
LH: loop header
LB: loop body
LE: loop exit
PB: predicated region body
PF: predicated region fallthrough
CT: control target
= control target key end

     0   :  { %10 = vsyncpa [#allocation3], 0  ;;  %s5997_s0 = inlined_call_operand.hbm [shape: f32[16,2048], index: 0, kind: input, shape index: {}]   ;;  %s5998_s1 = inlined_call_operand.hbm [shape: bf16[2048,512], index: 1, kind: input, shape index: {}]   ;;  %s5999_s2 = inlined_call_operand.hbm [shape: f32[1,512], index: 2, kind: input, shape index: {}]   ;;  %s6000_s3 = inlined_call_operand.hbm [shape: bf16[512,128], index: 3, kind: input, shape index: {}]   ;;  %s6001_s4 = inlined_call_operand.hbm [shape: f32[1,2], index: 4, kind: input, shape index: {}]   ;;  %s6002_s5 = inlined_call_operand.vmem [shape: f32[16,2], index: 5, kind: output, shape index: {}]  }
   0x1   :  { %11 = vsyncpa [#allocation5], 0 }
   0x2   :  { %12 = vsyncpa [#allocation8], 0  ;;  %s5790_s18 = smov [#allocation4]  }
   0x3   :  { %s30_s19 = sshll.u32 %s5790_s18, 4  ;;  %s31_s19 = int_to_ptr.vmem [resolvable:$true] %s30_s19 }
   0x4   :  { %s5692_s20 = scalar_lea.vmem %s31_s19, 65536  ;;  %p5697_p1 = scmp.lt.s32.totalorder %s31_s19, %s31_s19 }
   0x5   :  { %p5693_p0 = scmp.ne.s32.totalorder %s31_s19, %s5692_s20  ;;  %p5698_p2 = scmp.lt.s32.totalorder %s5692_s20, %s5692_s20 }
   0x7   :  { %p5699_p3 = por %p5698_p2, %p5697_p1 }
   0x9   :  { %p5700_p4 = pnand %p5699_p3, %p5693_p0 }
   0xb   :  { %5703 = shalt.err (!%p5700_p4)
}
   0xc   :  { %s5791_s21 = smov 256   ;;  %s5792_s22 = smov 16  }
   0xd   :  { %36 = dma.hbm_to_vmem [thread:$0]  %s5998_s1, 65536, %s31_s19, [#allocation5], %s5791_s21, %s5791_s21, %s5792_s22  }
   0xe   :  { %s5793_s25 = smov [#allocation7]  }
   0xf   :  { %s52_s26 = sshll.u32 %s5793_s25, 4  ;;  %s53_s26 = int_to_ptr.vmem [resolvable:$true] %s52_s26 }
  0x10   :  { %s5712_s27 = scalar_lea.vmem %s53_s26, 4096  ;;  %p5717_p6 = scmp.lt.s32.totalorder %s53_s26, %s53_s26 }
  0x11   :  { %p5713_p5 = scmp.ne.s32.totalorder %s53_s26, %s5712_s27  ;;  %p5718_p7 = scmp.lt.s32.totalorder %s5712_s27, %s5712_s27 }
  0x13   :  { %p5719_p8 = por %p5718_p7, %p5717_p6 }
  0x15   :  { %p5720_p9 = pnand %p5719_p8, %p5713_p5 }
  0x17   :  { %5723 = shalt.err (!%p5720_p9)
}
  0x18   :  { %s5794_s28 = smov 64   ;;  %s5795_s29 = smov 4  }
  0x19   :  { %58 = dma.hbm_to_vmem [thread:$0]  %s6000_s3, 4096, %s53_s26, [#allocation8], %s5794_s28, %s5794_s28, %s5795_s29  }
  0x1a   :  { %s5796_s7 = smov [#allocation2]  }
  0x1b   :  { %s18_s8 = sshll.u32 %s5796_s7, 4  ;;  %s19_s8 = int_to_ptr.vmem [resolvable:$true] %s18_s8 }
  0x1c   :  { %s5732_s1 = scalar_lea.vmem %s19_s8, 4096  ;;  %p5737_p11 = scmp.lt.s32.totalorder %s19_s8, %s19_s8 }
  0x1d   :  { %p5733_p10 = scmp.ne.s32.totalorder %s19_s8, %s5732_s1  ;;  %p5738_p12 = scmp.lt.s32.totalorder %s5732_s1, %s5732_s1 }
  0x1f   :  { %p5739_p13 = por %p5738_p12, %p5737_p11 }
  0x21   :  { %p5740_p0 = pnand %p5739_p13, %p5733_p10 }
  0x23   :  { %5743 = shalt.err (!%p5740_p0)
}
  0x24   :  { %s5797_s9 = smov 2048   ;;  %s5798_s10 = smov 128  }
  0x25   :  { %24 = dma.hbm_to_vmem [thread:$0]  %s5997_s0, 4096, %s19_s8, [#allocation3], %s5797_s9, %s5797_s9, %s5798_s10  }
  0x26   :  { %s5799_s13 = smov [#allocation6]   ;;  %s5800_s3 = smov [#allocation9]  }
  0x27   :  { %s43_s14 = sshll.u32 %s5799_s13, 4  ;;  %s65_s15 = sshll.u32 %s5800_s3, 4  ;;  %s44_s14 = int_to_ptr.vmem [resolvable:$true] %s43_s14  ;;  %s66_s15 = int_to_ptr.vmem [resolvable:$true] %s65_s15 }
  0x28   :  { %s5752_s16 = scalar_lea.vmem %s44_s14, 64  ;;  %p5757_p2 = scmp.lt.s32.totalorder %s44_s14, %s44_s14 }
  0x29   :  { %p5753_p1 = scmp.ne.s32.totalorder %s44_s14, %s5752_s16  ;;  %p5758_p3 = scmp.lt.s32.totalorder %s5752_s16, %s5752_s16 }
  0x2b   :  { %p5759_p4 = por %p5758_p3, %p5757_p2 }
  0x2d   :  { %p5760_p5 = pnand %p5759_p4, %p5753_p1 }
  0x2f   :  { %5763 = shalt.err (!%p5760_p5)
}
  0x30   :  { %46 = dma.hbm_to_vmem [thread:$0]  %s5999_s2, 64, %s44_s14, [#allocation5]  }
  0x31   :  { %s5772_s19 = scalar_lea.vmem %s66_s15, 16  ;;  %s5776_s0 = scalar_lea.vmem %s66_s15, 32 }
  0x32   :  { %p5773_p6 = scmp.ne.s32.totalorder %s66_s15, %s5772_s19  ;;  %p5777_p7 = scmp.lt.s32.totalorder %s66_s15, %s66_s15 }
  0x33   :  { %p5778_p8 = scmp.lt.s32.totalorder %s5776_s0, %s5772_s19 }
  0x35   :  { %p5779_p9 = por %p5778_p8, %p5777_p7 }
  0x37   :  { %p5780_p10 = pnand %p5779_p9, %p5773_p6 }
  0x39   :  { %5783 = shalt.err (!%p5780_p10)
}
  0x3a   :  { %68 = dma.hbm_to_vmem [thread:$0]  %s6001_s4, 16, %s66_s15, [#allocation8]  }
  0x3b   :  { %5784 = dma.done.wait [#allocation3], 4096  }
  0x3c   :  { %5785 = vsyncadd [#allocation3], 4294963200 }
  0x3d   :  { %5786 = dma.done.wait [#allocation5], 65600  }
  0x3e   :  { %5787 = vsyncadd [#allocation5], 4294901696 }
  0x3f   :  { %5788 = dma.done.wait [#allocation8], 4112  }
  0x40   :  { %5789 = vsyncadd [#allocation8], 4294963184  ;;  %v4884_v0 = vld [vmem:[#allocation4 + $0xe4] ss:$16 sps:$4 sm:$0xff]   ;;  %v4888_v2 = vld [vmem:[#allocation4 + $0xe0] ss:$16 sps:$4 sm:$0xff]  }
  0x41   :  { %v4886_v1 = vld [vmem:[#allocation4 + $0x2e4] ss:$16 sps:$4 sm:$0xff]   ;;  %3227 = vmatprep.subr.bf16.mxu0 %v4884_v0  ;;  %v4889_v3 = vld [vmem:[#allocation4 + $0x2e0] ss:$16 sps:$4 sm:$0xff]   ;;  %v86_v46 = vld [vmem:[#allocation2 + $0x8] sm:$0xff]  ;;  %vm4274_vm0 = vcmask 15360  }
  0x42   :  { %3270 = vmatprep.subr.bf16.mxu1 %v4886_v1  ;;  %v4890_v4 = vld [vmem:[#allocation4 + $0xc4] ss:$16 sps:$4 sm:$0xff]   ;;  %3228 = vmatpush1.bf16.msra.mxu0 %v4888_v2  ;;  %v4894_v6 = vld [vmem:[#allocation4 + $0xc0] ss:$16 sps:$4 sm:$0xff]   ;;  %v102_v47 = vld [vmem:[#allocation2 + $0x88] sm:$0xff] }
  0x43   :  { %3271 = vmatpush1.bf16.msra.mxu1 %v4889_v3  ;;  %v4892_v5 = vld [vmem:[#allocation4 + $0x2c4] ss:$16 sps:$4 sm:$0xff]   ;;  %3229 = vmatprep.subr.bf16.mxu0 %v4890_v4  ;;  %v4895_v7 = vld [vmem:[#allocation4 + $0x2c0] ss:$16 sps:$4 sm:$0xff]   ;;  %v88_v48 = vld [vmem:[#allocation2 + $0x18] sm:$0xff]  ;;  %v5846_v53 = vpack.c.bf16 %v102_v47, %v86_v46 }
  0x44   :  { %3272 = vmatprep.subr.bf16.mxu1 %v4892_v5  ;;  %v4896_v8 = vld [vmem:[#allocation4 + $0xa4] ss:$16 sps:$4 sm:$0xff]   ;;  %v4900_v10 = vld [vmem:[#allocation4 + $0xa0] ss:$16 sps:$4 sm:$0xff]   ;;  %v104_v49 = vld [vmem:[#allocation2 + $0x98] sm:$0xff] }
  0x45   :  { %v4898_v9 = vld [vmem:[#allocation4 + $0x2a4] ss:$16 sps:$4 sm:$0xff]   ;;  %v4901_v11 = vld [vmem:[#allocation4 + $0x2a0] ss:$16 sps:$4 sm:$0xff]   ;;  %v5848_v54 = vpack.c.bf16 %v104_v49, %v88_v48  ;;  %3259 = vmatprep.mubr.bf16.mxu0 %v5846_v53  ;;  %v108_v46 = vld [vmem:[#allocation2 + $0xb8] sm:$0xff] }
  0x46   :  { %3230 = vmatpush1.bf16.msra.mxu0 %v4894_v6  ;;  %v4902_v12 = vld [vmem:[#allocation4 + $0x84] ss:$16 sps:$4 sm:$0xff]   ;;  %v4906_v14 = vld [vmem:[#allocation4 + $0x80] ss:$16 sps:$4 sm:$0xff]  }
  0x47   :  { %3273 = vmatpush1.bf16.msra.mxu1 %v4895_v7  ;;  %3231 = vmatprep.subr.bf16.mxu0 %v4896_v8  ;;  %v4904_v13 = vld [vmem:[#allocation4 + $0x284] ss:$16 sps:$4 sm:$0xff]   ;;  %v4907_v15 = vld [vmem:[#allocation4 + $0x280] ss:$16 sps:$4 sm:$0xff]  }
  0x48   :  { %3274 = vmatprep.subr.bf16.mxu1 %v4898_v9  ;;  %v4908_v16 = vld [vmem:[#allocation4 + $0x64] ss:$16 sps:$4 sm:$0xff]   ;;  %v4912_v18 = vld [vmem:[#allocation4 + $0x60] ss:$16 sps:$4 sm:$0xff]   ;;  %3302 = vmatprep.mubr.bf16.mxu1 %v5848_v54 }
  0x49   :  { %v4910_v17 = vld [vmem:[#allocation4 + $0x264] ss:$16 sps:$4 sm:$0xff]   ;;  %v4913_v19 = vld [vmem:[#allocation4 + $0x260] ss:$16 sps:$4 sm:$0xff]  }
  0x4a   :  { %3232 = vmatpush1.bf16.msra.mxu0 %v4900_v10  ;;  %v4914_v20 = vld [vmem:[#allocation4 + $0x44] ss:$16 sps:$4 sm:$0xff]   ;;  %v4918_v22 = vld [vmem:[#allocation4 + $0x40] ss:$16 sps:$4 sm:$0xff]  }
  0x4b   :  { %3275 = vmatpush1.bf16.msra.mxu1 %v4901_v11  ;;  %3233 = vmatprep.subr.bf16.mxu0 %v4902_v12  ;;  %v4916_v21 = vld [vmem:[#allocation4 + $0x244] ss:$16 sps:$4 sm:$0xff]   ;;  %v4919_v23 = vld [vmem:[#allocation4 + $0x240] ss:$16 sps:$4 sm:$0xff]  }
  0x4c   :  { %3276 = vmatprep.subr.bf16.mxu1 %v4904_v13  ;;  %v4920_v24 = vld [vmem:[#allocation4 + $0x24] ss:$16 sps:$4 sm:$0xff]   ;;  %v4924_v26 = vld [vmem:[#allocation4 + $0x20] ss:$16 sps:$4 sm:$0xff]  }
  0x4d   :  { %v4922_v25 = vld [vmem:[#allocation4 + $0x224] ss:$16 sps:$4 sm:$0xff]   ;;  %v4925_v27 = vld [vmem:[#allocation4 + $0x220] ss:$16 sps:$4 sm:$0xff]  }
  0x4e   :  { %3234 = vmatpush1.bf16.msra.mxu0 %v4906_v14  ;;  %v4926_v28 = vld [vmem:[#allocation4 + $0x4] ss:$16 sps:$4 sm:$0xff]   ;;  %v4930_v30 = vld [vmem:[#allocation4] ss:$16 sps:$4 sm:$0xff]  }
  0x4f   :  { %3277 = vmatpush1.bf16.msra.mxu1 %v4907_v15  ;;  %3235 = vmatprep.subr.bf16.mxu0 %v4908_v16  ;;  %v4928_v29 = vld [vmem:[#allocation4 + $0x204] ss:$16 sps:$4 sm:$0xff]   ;;  %v4931_v31 = vld [vmem:[#allocation4 + $0x200] ss:$16 sps:$4 sm:$0xff]  }
  0x50   :  { %3278 = vmatprep.subr.bf16.mxu1 %v4910_v17  ;;  %v4932_v32 = vld [vmem:[#allocation4 + $0x1e4] ss:$16 sps:$4 sm:$0xff]   ;;  %v4936_v34 = vld [vmem:[#allocation4 + $0x1e0] ss:$16 sps:$4 sm:$0xff]  }
  0x51   :  { %v4934_v33 = vld [vmem:[#allocation4 + $0x3e4] ss:$16 sps:$4 sm:$0xff]   ;;  %v4937_v35 = vld [vmem:[#allocation4 + $0x3e0] ss:$16 sps:$4 sm:$0xff]  }
  0x52   :  { %3236 = vmatpush1.bf16.msra.mxu0 %v4912_v18  ;;  %v4938_v36 = vld [vmem:[#allocation4 + $0x1c4] ss:$16 sps:$4 sm:$0xff]   ;;  %v4942_v38 = vld [vmem:[#allocation4 + $0x1c0] ss:$16 sps:$4 sm:$0xff]  }
  0x53   :  { %3279 = vmatpush1.bf16.msra.mxu1 %v4913_v19  ;;  %3237 = vmatprep.subr.bf16.mxu0 %v4914_v20  ;;  %v4940_v37 = vld [vmem:[#allocation4 + $0x3c4] ss:$16 sps:$4 sm:$0xff]   ;;  %v4943_v39 = vld [vmem:[#allocation4 + $0x3c0] ss:$16 sps:$4 sm:$0xff]  }
  0x54   :  { %3280 = vmatprep.subr.bf16.mxu1 %v4916_v21  ;;  %v4944_v40 = vld [vmem:[#allocation4 + $0x1a4] ss:$16 sps:$4 sm:$0xff]   ;;  %v4948_v42 = vld [vmem:[#allocation4 + $0x1a0] ss:$16 sps:$4 sm:$0xff]  }
  0x55   :  { %v4946_v41 = vld [vmem:[#allocation4 + $0x3a4] ss:$16 sps:$4 sm:$0xff]   ;;  %v4949_v43 = vld [vmem:[#allocation4 + $0x3a0] ss:$16 sps:$4 sm:$0xff]  }
  0x56   :  { %3238 = vmatpush1.bf16.msra.mxu0 %v4918_v22  ;;  %v4950_v44 = vld [vmem:[#allocation4 + $0x184] ss:$16 sps:$4 sm:$0xff]   ;;  %v4954_v50 = vld [vmem:[#allocation4 + $0x180] ss:$16 sps:$4 sm:$0xff]  }
  0x57   :  { %3281 = vmatpush1.bf16.msra.mxu1 %v4919_v23  ;;  %3239 = vmatprep.subr.bf16.mxu0 %v4920_v24  ;;  %v4952_v45 = vld [vmem:[#allocation4 + $0x384] ss:$16 sps:$4 sm:$0xff]   ;;  %v4955_v51 = vld [vmem:[#allocation4 + $0x380] ss:$16 sps:$4 sm:$0xff]  }
  0x58   :  { %3282 = vmatprep.subr.bf16.mxu1 %v4922_v25  ;;  %v4956_v52 = vld [vmem:[#allocation4 + $0x164] ss:$16 sps:$4 sm:$0xff]   ;;  %v4960_v56 = vld [vmem:[#allocation4 + $0x160] ss:$16 sps:$4 sm:$0xff]  }
  0x59   :  { %v4958_v55 = vld [vmem:[#allocation4 + $0x364] ss:$16 sps:$4 sm:$0xff]   ;;  %v4961_v57 = vld [vmem:[#allocation4 + $0x360] ss:$16 sps:$4 sm:$0xff]  }
  0x5a   :  { %3240 = vmatpush1.bf16.msra.mxu0 %v4924_v26  ;;  %v4962_v58 = vld [vmem:[#allocation4 + $0x144] ss:$16 sps:$4 sm:$0xff]   ;;  %v4966_v60 = vld [vmem:[#allocation4 + $0x140] ss:$16 sps:$4 sm:$0xff]  }
  0x5b   :  { %3283 = vmatpush1.bf16.msra.mxu1 %v4925_v27  ;;  %3241 = vmatprep.subr.bf16.mxu0 %v4926_v28  ;;  %v4964_v59 = vld [vmem:[#allocation4 + $0x344] ss:$16 sps:$4 sm:$0xff]   ;;  %v4967_v61 = vld [vmem:[#allocation4 + $0x340] ss:$16 sps:$4 sm:$0xff]  }
  0x5c   :  { %3284 = vmatprep.subr.bf16.mxu1 %v4928_v29  ;;  %v4968_v62 = vld [vmem:[#allocation4 + $0x124] ss:$16 sps:$4 sm:$0xff]   ;;  %v4972_v0 = vld [vmem:[#allocation4 + $0x120] ss:$16 sps:$4 sm:$0xff]  }
  0x5d   :  { %v4970_v63 = vld [vmem:[#allocation4 + $0x324] ss:$16 sps:$4 sm:$0xff]   ;;  %v4973_v1 = vld [vmem:[#allocation4 + $0x320] ss:$16 sps:$4 sm:$0xff]  }
  0x5e   :  { %3242 = vmatpush1.bf16.msra.mxu0 %v4930_v30  ;;  %v4974_v2 = vld [vmem:[#allocation4 + $0x104] ss:$16 sps:$4 sm:$0xff]   ;;  %v4978_v4 = vld [vmem:[#allocation4 + $0x100] ss:$16 sps:$4 sm:$0xff]  }
  0x5f   :  { %3285 = vmatpush1.bf16.msra.mxu1 %v4931_v31  ;;  %3243 = vmatprep.subr.bf16.mxu0 %v4932_v32  ;;  %v4976_v3 = vld [vmem:[#allocation4 + $0x304] ss:$16 sps:$4 sm:$0xff]   ;;  %v4979_v5 = vld [vmem:[#allocation4 + $0x300] ss:$16 sps:$4 sm:$0xff]  }
  0x60   :  { %3286 = vmatprep.subr.bf16.mxu1 %v4934_v33  ;;  %v85_v6 = vld [vmem:[#allocation2] sm:$0xff]  ;;  %v87_v8 = vld [vmem:[#allocation2 + $0x10] sm:$0xff] }
  0x61   :  { %v101_v7 = vld [vmem:[#allocation2 + $0x80] sm:$0xff]  ;;  %v103_v9 = vld [vmem:[#allocation2 + $0x90] sm:$0xff] }
  0x62   :  { %3244 = vmatpush2.bf16.msra.mxu0 %v4936_v34  ;;  %v4982_v10 = vld [vmem:[#allocation4 + $0x4e4] ss:$16 sps:$4 sm:$0xff]   ;;  %v5852_v12 = vpack.c.bf16 %v101_v7, %v85_v6  ;;  %v5854_v13 = vpack.c.bf16 %v103_v9, %v87_v8  ;;  %v4980_v14 = vld [vmem:[#allocation4 + $0x4e0] ss:$16 sps:$4 sm:$0xff]  }
  0x63   :  { %3287 = vmatpush2.bf16.msra.mxu1 %v4937_v35  ;;  %3245 = vmatprep.subr.bf16.mxu0 %v4938_v36  ;;  %v4985_v11 = vld [vmem:[#allocation4 + $0x6e4] ss:$16 sps:$4 sm:$0xff]   ;;  %v4983_v15 = vld [vmem:[#allocation4 + $0x6e0] ss:$16 sps:$4 sm:$0xff]  }
  0x64   :  { %3288 = vmatprep.subr.bf16.mxu1 %v4940_v37  ;;  %v4988_v16 = vld [vmem:[#allocation4 + $0x4c4] ss:$16 sps:$4 sm:$0xff]   ;;  %v4986_v18 = vld [vmem:[#allocation4 + $0x4c0] ss:$16 sps:$4 sm:$0xff]  }
  0x65   :  { %v4991_v17 = vld [vmem:[#allocation4 + $0x6c4] ss:$16 sps:$4 sm:$0xff]   ;;  %v4989_v19 = vld [vmem:[#allocation4 + $0x6c0] ss:$16 sps:$4 sm:$0xff]  }
  0x66   :  { %3246 = vmatpush2.bf16.msra.mxu0 %v4942_v38  ;;  %v4994_v20 = vld [vmem:[#allocation4 + $0x4a4] ss:$16 sps:$4 sm:$0xff]   ;;  %v4992_v22 = vld [vmem:[#allocation4 + $0x4a0] ss:$16 sps:$4 sm:$0xff]  }
  0x67   :  { %3289 = vmatpush2.bf16.msra.mxu1 %v4943_v39  ;;  %3247 = vmatprep.subr.bf16.mxu0 %v4944_v40  ;;  %v4997_v21 = vld [vmem:[#allocation4 + $0x6a4] ss:$16 sps:$4 sm:$0xff]   ;;  %v4995_v23 = vld [vmem:[#allocation4 + $0x6a0] ss:$16 sps:$4 sm:$0xff]   ;;  %v90_v40 = vld [vmem:[#allocation2 + $0x28] sm:$0xff] }
  0x68   :  { %3290 = vmatprep.subr.bf16.mxu1 %v4946_v41  ;;  %v5000_v24 = vld [vmem:[#allocation4 + $0x484] ss:$16 sps:$4 sm:$0xff]   ;;  %v4998_v26 = vld [vmem:[#allocation4 + $0x480] ss:$16 sps:$4 sm:$0xff]   ;;  %v106_v41 = vld [vmem:[#allocation2 + $0xa8] sm:$0xff] }
  0x69   :  { %v5003_v25 = vld [vmem:[#allocation4 + $0x684] ss:$16 sps:$4 sm:$0xff]   ;;  %v5001_v27 = vld [vmem:[#allocation4 + $0x680] ss:$16 sps:$4 sm:$0xff]  }
  0x6a   :  { %3248 = vmatpush2.bf16.msra.mxu0 %v4948_v42  ;;  %v5006_v28 = vld [vmem:[#allocation4 + $0x464] ss:$16 sps:$4 sm:$0xff]   ;;  %v5004_v30 = vld [vmem:[#allocation4 + $0x460] ss:$16 sps:$4 sm:$0xff]   ;;  %v92_v42 = vld [vmem:[#allocation2 + $0x38] sm:$0xff] }
  0x6b   :  { %3291 = vmatpush2.bf16.msra.mxu1 %v4949_v43  ;;  %3249 = vmatprep.subr.bf16.mxu0 %v4950_v44  ;;  %v5009_v29 = vld [vmem:[#allocation4 + $0x664] ss:$16 sps:$4 sm:$0xff]   ;;  %v5007_v31 = vld [vmem:[#allocation4 + $0x660] ss:$16 sps:$4 sm:$0xff]   ;;  %v5860_v47 = vpack.c.bf16 %v108_v46, %v92_v42  ;;  %v112_v42 = vld [vmem:[#allocation2 + $0xd8] sm:$0xff] }
  0x6c   :  { %3292 = vmatprep.subr.bf16.mxu1 %v4952_v45  ;;  %v5012_v32 = vld [vmem:[#allocation4 + $0x444] ss:$16 sps:$4 sm:$0xff]   ;;  %v5010_v34 = vld [vmem:[#allocation4 + $0x440] ss:$16 sps:$4 sm:$0xff]   ;;  %v5858_v45 = vpack.c.bf16 %v106_v41, %v90_v40  ;;  %v96_v41 = vld [vmem:[#allocation2 + $0x58] sm:$0xff] }
  0x6d   :  { %v5015_v33 = vld [vmem:[#allocation4 + $0x644] ss:$16 sps:$4 sm:$0xff]   ;;  %v5013_v35 = vld [vmem:[#allocation4 + $0x640] ss:$16 sps:$4 sm:$0xff]   ;;  %v5872_v46 = vpack.c.bf16 %v112_v42, %v96_v41 }
  0x6e   :  { %3250 = vmatpush2.bf16.msra.mxu0 %v4954_v50  ;;  %v5018_v36 = vld [vmem:[#allocation4 + $0x424] ss:$16 sps:$4 sm:$0xff]   ;;  %v5016_v38 = vld [vmem:[#allocation4 + $0x420] ss:$16 sps:$4 sm:$0xff]  }
  0x6f   :  { %3293 = vmatpush2.bf16.msra.mxu1 %v4955_v51  ;;  %3251 = vmatprep.subr.bf16.mxu0 %v4956_v52  ;;  %v5021_v37 = vld [vmem:[#allocation4 + $0x624] ss:$16 sps:$4 sm:$0xff]   ;;  %v5019_v39 = vld [vmem:[#allocation4 + $0x620] ss:$16 sps:$4 sm:$0xff]  }
  0x70   :  { %3294 = vmatprep.subr.bf16.mxu1 %v4958_v55  ;;  %v5024_v43 = vld [vmem:[#allocation4 + $0x404] ss:$16 sps:$4 sm:$0xff]   ;;  %v5022_v48 = vld [vmem:[#allocation4 + $0x400] ss:$16 sps:$4 sm:$0xff]  }
  0x71   :  { %v5027_v44 = vld [vmem:[#allocation4 + $0x604] ss:$16 sps:$4 sm:$0xff]   ;;  %v5025_v49 = vld [vmem:[#allocation4 + $0x600] ss:$16 sps:$4 sm:$0xff]  }
  0x72   :  { %3252 = vmatpush2.bf16.msra.mxu0 %v4960_v56  ;;  %v5030_v50 = vld [vmem:[#allocation4 + $0x5e4] ss:$16 sps:$4 sm:$0xff]   ;;  %v5028_v52 = vld [vmem:[#allocation4 + $0x5e0] ss:$16 sps:$4 sm:$0xff]  }
  0x73   :  { %3295 = vmatpush2.bf16.msra.mxu1 %v4961_v57  ;;  %3253 = vmatprep.subr.bf16.mxu0 %v4962_v58  ;;  %v5033_v51 = vld [vmem:[#allocation4 + $0x7e4] ss:$16 sps:$4 sm:$0xff]   ;;  %v5031_v55 = vld [vmem:[#allocation4 + $0x7e0] ss:$16 sps:$4 sm:$0xff]  }
  0x74   :  { %3296 = vmatprep.subr.bf16.mxu1 %v4964_v59  ;;  %v5036_v56 = vld [vmem:[#allocation4 + $0x5c4] ss:$16 sps:$4 sm:$0xff]   ;;  %v5034_v58 = vld [vmem:[#allocation4 + $0x5c0] ss:$16 sps:$4 sm:$0xff]  }
  0x75   :  { %v5039_v57 = vld [vmem:[#allocation4 + $0x7c4] ss:$16 sps:$4 sm:$0xff]   ;;  %v5037_v59 = vld [vmem:[#allocation4 + $0x7c0] ss:$16 sps:$4 sm:$0xff]  }
  0x76   :  { %3254 = vmatpush2.bf16.msra.mxu0 %v4966_v60  ;;  %v5042_v60 = vld [vmem:[#allocation4 + $0x5a4] ss:$16 sps:$4 sm:$0xff]   ;;  %v5052_v6 = vld [vmem:[#allocation4 + $0x560] ss:$16 sps:$4 sm:$0xff]  }
  0x77   :  { %3297 = vmatpush2.bf16.msra.mxu1 %v4967_v61  ;;  %3255 = vmatprep.subr.bf16.mxu0 %v4968_v62  ;;  %v5045_v61 = vld [vmem:[#allocation4 + $0x7a4] ss:$16 sps:$4 sm:$0xff]   ;;  %v5040_v62 = vld [vmem:[#allocation4 + $0x5a0] ss:$16 sps:$4 sm:$0xff]  }
  0x78   :  { %3298 = vmatprep.subr.bf16.mxu1 %v4970_v63  ;;  %v5043_v63 = vld [vmem:[#allocation4 + $0x7a0] ss:$16 sps:$4 sm:$0xff]   ;;  %v5060_v8 = vld [vmem:[#allocation4 + $0x544] ss:$16 sps:$4 sm:$0xff]  }
  0x79   :  { %v5055_v7 = vld [vmem:[#allocation4 + $0x760] ss:$16 sps:$4 sm:$0xff]   ;;  %v5063_v9 = vld [vmem:[#allocation4 + $0x744] ss:$16 sps:$4 sm:$0xff]  }
  0x7a   :  { %3256 = vmatpush2.bf16.msra.mxu0 %v4972_v0  ;;  %v5048_v0 = vld [vmem:[#allocation4 + $0x584] ss:$16 sps:$4 sm:$0xff]   ;;  %v5166_v41 = vld [vmem:[#allocation4 + $0x900] ss:$16 sps:$4 sm:$0xff]  }
  0x7b   :  { %3299 = vmatpush2.bf16.msra.mxu1 %v4973_v1  ;;  %3257 = vmatprep.subr.bf16.mxu0 %v4974_v2  ;;  %v5051_v1 = vld [vmem:[#allocation4 + $0x784] ss:$16 sps:$4 sm:$0xff]   ;;  %v5046_v2 = vld [vmem:[#allocation4 + $0x580] ss:$16 sps:$4 sm:$0xff]  }
  0x7c   :  { %3300 = vmatprep.subr.bf16.mxu1 %v4976_v3  ;;  %v5049_v3 = vld [vmem:[#allocation4 + $0x780] ss:$16 sps:$4 sm:$0xff]  }
  0x7d   :  { %v5169_v42 = vld [vmem:[#allocation4 + $0xb00] ss:$16 sps:$4 sm:$0xff]  }
  0x7e   :  { %3258 = vmatpush2.bf16.msra.mxu0 %v4978_v4  ;;  %v5054_v4 = vld [vmem:[#allocation4 + $0x564] ss:$16 sps:$4 sm:$0xff]  }
  0x7f   :  { %3301 = vmatpush2.bf16.msra.mxu1 %v4979_v5  ;;  %3313 = vmatprep.subr.bf16.mxu0 %v4982_v10  ;;  %v5057_v5 = vld [vmem:[#allocation4 + $0x764] ss:$16 sps:$4 sm:$0xff]   ;;  %v5058_v10 = vld [vmem:[#allocation4 + $0x540] ss:$16 sps:$4 sm:$0xff]  }
  0x80   :  { %3356 = vmatprep.subr.bf16.mxu1 %v4985_v11  ;;  %v5061_v11 = vld [vmem:[#allocation4 + $0x740] ss:$16 sps:$4 sm:$0xff]  }
  0x81   :  { %3260 = vmatmul.mubr.bf16.vlgmr.msra.gmra.mxu0 %v5852_v12 }
  0x82   :  { %3303 = vmatmul.mubr.bf16.vlgmr.msra.gmra.mxu1 %v5854_v13  ;;  %3314 = vmatpush1.bf16.msra.mxu0 %v4980_v14  ;;  %v5066_v14 = vld [vmem:[#allocation4 + $0x524] ss:$16 sps:$4 sm:$0xff]  }
  0x83   :  { %3357 = vmatpush1.bf16.msra.mxu1 %v4983_v15  ;;  %3315 = vmatprep.subr.bf16.mxu0 %v4988_v16  ;;  %v5069_v15 = vld [vmem:[#allocation4 + $0x724] ss:$16 sps:$4 sm:$0xff]   ;;  %v5064_v16 = vld [vmem:[#allocation4 + $0x520] ss:$16 sps:$4 sm:$0xff]  }
  0x84   :  { %3358 = vmatprep.subr.bf16.mxu1 %v4991_v17  ;;  %3345 = vmatprep.mubr.bf16.mxu0 %v5858_v45  ;;  %v5067_v17 = vld [vmem:[#allocation4 + $0x720] ss:$16 sps:$4 sm:$0xff]  }
  0x85   :  { %3388 = vmatprep.mubr.bf16.mxu1 %v5860_v47 }
  0x86   :  { %3316 = vmatpush1.bf16.msra.mxu0 %v4986_v18  ;;  %v5072_v18 = vld [vmem:[#allocation4 + $0x504] ss:$16 sps:$4 sm:$0xff]  }
  0x87   :  { %3359 = vmatpush1.bf16.msra.mxu1 %v4989_v19  ;;  %3317 = vmatprep.subr.bf16.mxu0 %v4994_v20  ;;  %v5075_v19 = vld [vmem:[#allocation4 + $0x704] ss:$16 sps:$4 sm:$0xff]   ;;  %v5070_v20 = vld [vmem:[#allocation4 + $0x500] ss:$16 sps:$4 sm:$0xff]  }
  0x88   :  { %3360 = vmatprep.subr.bf16.mxu1 %v4997_v21  ;;  %v5073_v21 = vld [vmem:[#allocation4 + $0x700] ss:$16 sps:$4 sm:$0xff]  }
  0x8a   :  { %3318 = vmatpush1.bf16.msra.mxu0 %v4992_v22  ;;  %v89_v22 = vld [vmem:[#allocation2 + $0x20] sm:$0xff] }
  0x8b   :  { %3361 = vmatpush1.bf16.msra.mxu1 %v4995_v23  ;;  %3319 = vmatprep.subr.bf16.mxu0 %v5000_v24  ;;  %v105_v23 = vld [vmem:[#allocation2 + $0xa0] sm:$0xff]  ;;  %v91_v24 = vld [vmem:[#allocation2 + $0x30] sm:$0xff] }
  0x8c   :  { %3362 = vmatprep.subr.bf16.mxu1 %v5003_v25  ;;  %v107_v25 = vld [vmem:[#allocation2 + $0xb0] sm:$0xff] }
  0x8e   :  { %3320 = vmatpush1.bf16.msra.mxu0 %v4998_v26  ;;  %v5078_v26 = vld [vmem:[#allocation4 + $0x8e4] ss:$16 sps:$4 sm:$0xff]  }
  0x8f   :  { %3363 = vmatpush1.bf16.msra.mxu1 %v5001_v27  ;;  %3321 = vmatprep.subr.bf16.mxu0 %v5006_v28  ;;  %v5081_v27 = vld [vmem:[#allocation4 + $0xae4] ss:$16 sps:$4 sm:$0xff]   ;;  %v5864_v28 = vpack.c.bf16 %v105_v23, %v89_v22  ;;  %v5142_v22 = vld [vmem:[#allocation4 + $0x980] ss:$16 sps:$4 sm:$0xff]  }
  0x90   :  { %3364 = vmatprep.subr.bf16.mxu1 %v5009_v29  ;;  %v5866_v29 = vpack.c.bf16 %v107_v25, %v91_v24  ;;  %v5145_v23 = vld [vmem:[#allocation4 + $0xb80] ss:$16 sps:$4 sm:$0xff]   ;;  %v5150_v24 = vld [vmem:[#allocation4 + $0x964] ss:$16 sps:$4 sm:$0xff]  }
  0x91   :  { %v5153_v25 = vld [vmem:[#allocation4 + $0xb64] ss:$16 sps:$4 sm:$0xff]  }
  0x92   :  { %3322 = vmatpush1.bf16.msra.mxu0 %v5004_v30  ;;  %v5076_v30 = vld [vmem:[#allocation4 + $0x8e0] ss:$16 sps:$4 sm:$0xff]  }
  0x93   :  { %3365 = vmatpush1.bf16.msra.mxu1 %v5007_v31  ;;  %3323 = vmatprep.subr.bf16.mxu0 %v5012_v32  ;;  %v5079_v31 = vld [vmem:[#allocation4 + $0xae0] ss:$16 sps:$4 sm:$0xff]   ;;  %v5084_v32 = vld [vmem:[#allocation4 + $0x8c4] ss:$16 sps:$4 sm:$0xff]  }
  0x94   :  { %3366 = vmatprep.subr.bf16.mxu1 %v5015_v33  ;;  %v5087_v33 = vld [vmem:[#allocation4 + $0xac4] ss:$16 sps:$4 sm:$0xff]  }
  0x96   :  { %3324 = vmatpush1.bf16.msra.mxu0 %v5010_v34  ;;  %v5082_v34 = vld [vmem:[#allocation4 + $0x8c0] ss:$16 sps:$4 sm:$0xff]  }
  0x97   :  { %3367 = vmatpush1.bf16.msra.mxu1 %v5013_v35  ;;  %3325 = vmatprep.subr.bf16.mxu0 %v5018_v36  ;;  %v5085_v35 = vld [vmem:[#allocation4 + $0xac0] ss:$16 sps:$4 sm:$0xff]   ;;  %v5090_v36 = vld [vmem:[#allocation4 + $0x8a4] ss:$16 sps:$4 sm:$0xff]  }
  0x98   :  { %3368 = vmatprep.subr.bf16.mxu1 %v5021_v37  ;;  %v5093_v37 = vld [vmem:[#allocation4 + $0xaa4] ss:$16 sps:$4 sm:$0xff]  }
  0x9a   :  { %3326 = vmatpush1.bf16.msra.mxu0 %v5016_v38  ;;  %v94_v38 = vld [vmem:[#allocation2 + $0x48] sm:$0xff] }
  0x9b   :  { %3369 = vmatpush1.bf16.msra.mxu1 %v5019_v39  ;;  %3327 = vmatprep.subr.bf16.mxu0 %v5024_v43  ;;  %v110_v39 = vld [vmem:[#allocation2 + $0xc8] sm:$0xff]  ;;  %v5088_v43 = vld [vmem:[#allocation4 + $0x8a0] ss:$16 sps:$4 sm:$0xff]  }
  0x9c   :  { %3370 = vmatprep.subr.bf16.mxu1 %v5027_v44  ;;  %v5870_v40 = vpack.c.bf16 %v110_v39, %v94_v38  ;;  %v5091_v44 = vld [vmem:[#allocation4 + $0xaa0] ss:$16 sps:$4 sm:$0xff]   ;;  %v5168_v38 = vld [vmem:[#allocation4 + $0x904] ss:$16 sps:$4 sm:$0xff]  }
  0x9d   :  { %v5171_v39 = vld [vmem:[#allocation4 + $0xb04] ss:$16 sps:$4 sm:$0xff]  }
  0x9e   :  { %3328 = vmatpush1.bf16.msra.mxu0 %v5022_v48  ;;  %v5096_v48 = vld [vmem:[#allocation4 + $0x884] ss:$16 sps:$4 sm:$0xff]  }
  0x9f   :  { %3371 = vmatpush1.bf16.msra.mxu1 %v5025_v49  ;;  %3329 = vmatprep.subr.bf16.mxu0 %v5030_v50  ;;  %v5099_v49 = vld [vmem:[#allocation4 + $0xa84] ss:$16 sps:$4 sm:$0xff]   ;;  %v5094_v50 = vld [vmem:[#allocation4 + $0x880] ss:$16 sps:$4 sm:$0xff]  }
  0xa0   :  { %3372 = vmatprep.subr.bf16.mxu1 %v5033_v51  ;;  %v5097_v51 = vld [vmem:[#allocation4 + $0xa80] ss:$16 sps:$4 sm:$0xff]  }
  0xa2   :  { %3330 = vmatpush2.bf16.msra.mxu0 %v5028_v52  ;;  %v5102_v52 = vld [vmem:[#allocation4 + $0x864] ss:$16 sps:$4 sm:$0xff]  }
  0xa3   :  { %3373 = vmatpush2.bf16.msra.mxu1 %v5031_v55  ;;  %3331 = vmatprep.subr.bf16.mxu0 %v5036_v56  ;;  %v5105_v55 = vld [vmem:[#allocation4 + $0xa64] ss:$16 sps:$4 sm:$0xff]   ;;  %v5100_v56 = vld [vmem:[#allocation4 + $0x860] ss:$16 sps:$4 sm:$0xff]  }
  0xa4   :  { %3374 = vmatprep.subr.bf16.mxu1 %v5039_v57  ;;  %v5103_v57 = vld [vmem:[#allocation4 + $0xa60] ss:$16 sps:$4 sm:$0xff]  }
  0xa6   :  { %3332 = vmatpush2.bf16.msra.mxu0 %v5034_v58  ;;  %v5108_v58 = vld [vmem:[#allocation4 + $0x844] ss:$16 sps:$4 sm:$0xff]  }
  0xa7   :  { %3375 = vmatpush2.bf16.msra.mxu1 %v5037_v59  ;;  %3333 = vmatprep.subr.bf16.mxu0 %v5042_v60  ;;  %v5111_v59 = vld [vmem:[#allocation4 + $0xa44] ss:$16 sps:$4 sm:$0xff]   ;;  %v5106_v60 = vld [vmem:[#allocation4 + $0x840] ss:$16 sps:$4 sm:$0xff]  }
  0xa8   :  { %3376 = vmatprep.subr.bf16.mxu1 %v5045_v61  ;;  %v5109_v61 = vld [vmem:[#allocation4 + $0xa40] ss:$16 sps:$4 sm:$0xff]  }
  0xaa   :  { %3334 = vmatpush2.bf16.msra.mxu0 %v5040_v62  ;;  %v5114_v62 = vld [vmem:[#allocation4 + $0x824] ss:$16 sps:$4 sm:$0xff]  }
  0xab   :  { %3377 = vmatpush2.bf16.msra.mxu1 %v5043_v63  ;;  %3335 = vmatprep.subr.bf16.mxu0 %v5048_v0  ;;  %v5117_v63 = vld [vmem:[#allocation4 + $0xa24] ss:$16 sps:$4 sm:$0xff]   ;;  %v5112_v0 = vld [vmem:[#allocation4 + $0x820] ss:$16 sps:$4 sm:$0xff]  }
  0xac   :  { %3378 = vmatprep.subr.bf16.mxu1 %v5051_v1  ;;  %v5115_v1 = vld [vmem:[#allocation4 + $0xa20] ss:$16 sps:$4 sm:$0xff]  }
  0xae   :  { %3336 = vmatpush2.bf16.msra.mxu0 %v5046_v2  ;;  %v5120_v2 = vld [vmem:[#allocation4 + $0x804] ss:$16 sps:$4 sm:$0xff]  }
  0xaf   :  { %3379 = vmatpush2.bf16.msra.mxu1 %v5049_v3  ;;  %3337 = vmatprep.subr.bf16.mxu0 %v5054_v4  ;;  %v5123_v3 = vld [vmem:[#allocation4 + $0xa04] ss:$16 sps:$4 sm:$0xff]   ;;  %v5118_v4 = vld [vmem:[#allocation4 + $0x800] ss:$16 sps:$4 sm:$0xff]  }
  0xb0   :  { %3380 = vmatprep.subr.bf16.mxu1 %v5057_v5  ;;  %v5121_v5 = vld [vmem:[#allocation4 + $0xa00] ss:$16 sps:$4 sm:$0xff]  }
  0xb2   :  { %3338 = vmatpush2.bf16.msra.mxu0 %v5052_v6  ;;  %v5126_v6 = vld [vmem:[#allocation4 + $0x9e4] ss:$16 sps:$4 sm:$0xff]  }
  0xb3   :  { %3381 = vmatpush2.bf16.msra.mxu1 %v5055_v7  ;;  %3339 = vmatprep.subr.bf16.mxu0 %v5060_v8  ;;  %v5129_v7 = vld [vmem:[#allocation4 + $0xbe4] ss:$16 sps:$4 sm:$0xff]   ;;  %v5124_v8 = vld [vmem:[#allocation4 + $0x9e0] ss:$16 sps:$4 sm:$0xff]  }
  0xb4   :  { %3382 = vmatprep.subr.bf16.mxu1 %v5063_v9  ;;  %v5127_v9 = vld [vmem:[#allocation4 + $0xbe0] ss:$16 sps:$4 sm:$0xff]  }
  0xb6   :  { %3340 = vmatpush2.bf16.msra.mxu0 %v5058_v10  ;;  %v5132_v10 = vld [vmem:[#allocation4 + $0x9c4] ss:$16 sps:$4 sm:$0xff]  }
  0xb7   :  { %3383 = vmatpush2.bf16.msra.mxu1 %v5061_v11  ;;  %3341 = vmatprep.subr.bf16.mxu0 %v5066_v14  ;;  %v5135_v11 = vld [vmem:[#allocation4 + $0xbc4] ss:$16 sps:$4 sm:$0xff]   ;;  %v5130_v14 = vld [vmem:[#allocation4 + $0x9c0] ss:$16 sps:$4 sm:$0xff]  }
  0xb8   :  { %3384 = vmatprep.subr.bf16.mxu1 %v5069_v15  ;;  %v5133_v15 = vld [vmem:[#allocation4 + $0xbc0] ss:$16 sps:$4 sm:$0xff]  }
  0xba   :  { %3342 = vmatpush2.bf16.msra.mxu0 %v5064_v16  ;;  %v5138_v16 = vld [vmem:[#allocation4 + $0x9a4] ss:$16 sps:$4 sm:$0xff]  }
  0xbb   :  { %3385 = vmatpush2.bf16.msra.mxu1 %v5067_v17  ;;  %3343 = vmatprep.subr.bf16.mxu0 %v5072_v18  ;;  %v5141_v17 = vld [vmem:[#allocation4 + $0xba4] ss:$16 sps:$4 sm:$0xff]   ;;  %v5136_v18 = vld [vmem:[#allocation4 + $0x9a0] ss:$16 sps:$4 sm:$0xff]  }
  0xbc   :  { %3386 = vmatprep.subr.bf16.mxu1 %v5075_v19  ;;  %v5139_v19 = vld [vmem:[#allocation4 + $0xba0] ss:$16 sps:$4 sm:$0xff]  }
  0xbe   :  { %3344 = vmatpush2.bf16.msra.mxu0 %v5070_v20  ;;  %v5144_v20 = vld [vmem:[#allocation4 + $0x984] ss:$16 sps:$4 sm:$0xff]  }
  0xbf   :  { %3387 = vmatpush2.bf16.msra.mxu1 %v5073_v21  ;;  %3399 = vmatprep.subr.bf16.mxu0 %v5078_v26  ;;  %v5147_v21 = vld [vmem:[#allocation4 + $0xb84] ss:$16 sps:$4 sm:$0xff]   ;;  %v5148_v26 = vld [vmem:[#allocation4 + $0x960] ss:$16 sps:$4 sm:$0xff]  }
  0xc0   :  { %3442 = vmatprep.subr.bf16.mxu1 %v5081_v27  ;;  %v5151_v27 = vld [vmem:[#allocation4 + $0xb60] ss:$16 sps:$4 sm:$0xff]  }
  0xc1   :  { %3346 = vmatmul.mubr.bf16.vlgmr.msra.gmra.mxu0 %v5864_v28 }
  0xc2   :  { %3389 = vmatmul.mubr.bf16.vlgmr.msra.gmra.mxu1 %v5866_v29  ;;  %3400 = vmatpush1.bf16.msra.mxu0 %v5076_v30  ;;  %v5156_v30 = vld [vmem:[#allocation4 + $0x944] ss:$16 sps:$4 sm:$0xff]  }
  0xc3   :  { %3443 = vmatpush1.bf16.msra.mxu1 %v5079_v31  ;;  %3401 = vmatprep.subr.bf16.mxu0 %v5084_v32  ;;  %v5159_v31 = vld [vmem:[#allocation4 + $0xb44] ss:$16 sps:$4 sm:$0xff]   ;;  %v5154_v32 = vld [vmem:[#allocation4 + $0x940] ss:$16 sps:$4 sm:$0xff]  }
  0xc4   :  { %3444 = vmatprep.subr.bf16.mxu1 %v5087_v33  ;;  %3431 = vmatprep.mubr.bf16.mxu0 %v5870_v40  ;;  %v5157_v33 = vld [vmem:[#allocation4 + $0xb40] ss:$16 sps:$4 sm:$0xff]  }
  0xc5   :  { %3474 = vmatprep.mubr.bf16.mxu1 %v5872_v46 }
  0xc6   :  { %3402 = vmatpush1.bf16.msra.mxu0 %v5082_v34  ;;  %v5162_v34 = vld [vmem:[#allocation4 + $0x924] ss:$16 sps:$4 sm:$0xff]  }
  0xc7   :  { %3445 = vmatpush1.bf16.msra.mxu1 %v5085_v35  ;;  %3403 = vmatprep.subr.bf16.mxu0 %v5090_v36  ;;  %v5165_v35 = vld [vmem:[#allocation4 + $0xb24] ss:$16 sps:$4 sm:$0xff]   ;;  %v5160_v36 = vld [vmem:[#allocation4 + $0x920] ss:$16 sps:$4 sm:$0xff]  }
  0xc8   :  { %3446 = vmatprep.subr.bf16.mxu1 %v5093_v37  ;;  %v5163_v37 = vld [vmem:[#allocation4 + $0xb20] ss:$16 sps:$4 sm:$0xff]  }
  0xca   :  { %3404 = vmatpush1.bf16.msra.mxu0 %v5088_v43  ;;  %v93_v43 = vld [vmem:[#allocation2 + $0x40] sm:$0xff] }
  0xcb   :  { %3447 = vmatpush1.bf16.msra.mxu1 %v5091_v44  ;;  %3405 = vmatprep.subr.bf16.mxu0 %v5096_v48  ;;  %v109_v44 = vld [vmem:[#allocation2 + $0xc0] sm:$0xff]  ;;  %v95_v48 = vld [vmem:[#allocation2 + $0x50] sm:$0xff] }
  0xcc   :  { %3448 = vmatprep.subr.bf16.mxu1 %v5099_v49  ;;  %v111_v49 = vld [vmem:[#allocation2 + $0xd0] sm:$0xff] }
  0xce   :  { %3406 = vmatpush1.bf16.msra.mxu0 %v5094_v50  ;;  %v5174_v50 = vld [vmem:[#allocation4 + $0xce4] ss:$16 sps:$4 sm:$0xff]  }
  0xcf   :  { %3449 = vmatpush1.bf16.msra.mxu1 %v5097_v51  ;;  %3407 = vmatprep.subr.bf16.mxu0 %v5102_v52  ;;  %v5177_v51 = vld [vmem:[#allocation4 + $0xee4] ss:$16 sps:$4 sm:$0xff]   ;;  %v98_v52 = vld [vmem:[#allocation2 + $0x68] sm:$0xff] }
  0xd0   :  { %3450 = vmatprep.subr.bf16.mxu1 %v5105_v55  ;;  %v5172_v55 = vld [vmem:[#allocation4 + $0xce0] ss:$16 sps:$4 sm:$0xff]  }
  0xd2   :  { %3408 = vmatpush1.bf16.msra.mxu0 %v5100_v56  ;;  %v114_v56 = vld [vmem:[#allocation2 + $0xe8] sm:$0xff] }
  0xd3   :  { %3451 = vmatpush1.bf16.msra.mxu1 %v5103_v57  ;;  %3409 = vmatprep.subr.bf16.mxu0 %v5108_v58  ;;  %v100_v57 = vld [vmem:[#allocation2 + $0x78] sm:$0xff]  ;;  %v5876_v58 = vpack.c.bf16 %v109_v44, %v93_v43  ;;  %v5232_v43 = vld [vmem:[#allocation4 + $0xda0] ss:$16 sps:$4 sm:$0xff]  }
  0xd4   :  { %3452 = vmatprep.subr.bf16.mxu1 %v5111_v59  ;;  %v5878_v59 = vpack.c.bf16 %v111_v49, %v95_v48  ;;  %v5235_v44 = vld [vmem:[#allocation4 + $0xfa0] ss:$16 sps:$4 sm:$0xff]   ;;  %v5240_v48 = vld [vmem:[#allocation4 + $0xd84] ss:$16 sps:$4 sm:$0xff]  }
  0xd5   :  { %v5243_v49 = vld [vmem:[#allocation4 + $0xf84] ss:$16 sps:$4 sm:$0xff]  }
  0xd6   :  { %3410 = vmatpush1.bf16.msra.mxu0 %v5106_v60  ;;  %v116_v60 = vld [vmem:[#allocation2 + $0xf8] sm:$0xff] }
  0xd7   :  { %3453 = vmatpush1.bf16.msra.mxu1 %v5109_v61  ;;  %3411 = vmatprep.subr.bf16.mxu0 %v5114_v62  ;;  %v5175_v61 = vld [vmem:[#allocation4 + $0xee0] ss:$16 sps:$4 sm:$0xff]   ;;  %v5180_v62 = vld [vmem:[#allocation4 + $0xcc4] ss:$16 sps:$4 sm:$0xff]  }
  0xd8   :  { %3454 = vmatprep.subr.bf16.mxu1 %v5117_v63  ;;  %v5183_v63 = vld [vmem:[#allocation4 + $0xec4] ss:$16 sps:$4 sm:$0xff]  }
  0xda   :  { %3412 = vmatpush1.bf16.msra.mxu0 %v5112_v0  ;;  %v5880_v0 = vpack.c.bf16 %v114_v56, %v98_v52  ;;  %v5246_v52 = vld [vmem:[#allocation4 + $0xd64] ss:$16 sps:$4 sm:$0xff]   ;;  %v5244_v56 = vld [vmem:[#allocation4 + $0xd60] ss:$16 sps:$4 sm:$0xff]  }
  0xdb   :  { %3455 = vmatpush1.bf16.msra.mxu1 %v5115_v1  ;;  %3413 = vmatprep.subr.bf16.mxu0 %v5120_v2  ;;  %v5882_v1 = vpack.c.bf16 %v116_v60, %v100_v57  ;;  %v5178_v2 = vld [vmem:[#allocation4 + $0xcc0] ss:$16 sps:$4 sm:$0xff]   ;;  %v5252_v60 = vld [vmem:[#allocation4 + $0xd44] ss:$16 sps:$4 sm:$0xff]  }
  0xdc   :  { %3456 = vmatprep.subr.bf16.mxu1 %v5123_v3  ;;  %v5181_v3 = vld [vmem:[#allocation4 + $0xec0] ss:$16 sps:$4 sm:$0xff]  }
  0xdd   :  { %v5247_v57 = vld [vmem:[#allocation4 + $0xf60] ss:$16 sps:$4 sm:$0xff]  }
  0xde   :  { %3414 = vmatpush1.bf16.msra.mxu0 %v5118_v4  ;;  %v5186_v4 = vld [vmem:[#allocation4 + $0xca4] ss:$16 sps:$4 sm:$0xff]  }
  0xdf   :  { %3457 = vmatpush1.bf16.msra.mxu1 %v5121_v5  ;;  %3415 = vmatprep.subr.bf16.mxu0 %v5126_v6  ;;  %v5189_v5 = vld [vmem:[#allocation4 + $0xea4] ss:$16 sps:$4 sm:$0xff]   ;;  %v5184_v6 = vld [vmem:[#allocation4 + $0xca0] ss:$16 sps:$4 sm:$0xff]  }
  0xe0   :  { %3458 = vmatprep.subr.bf16.mxu1 %v5129_v7  ;;  %v5187_v7 = vld [vmem:[#allocation4 + $0xea0] ss:$16 sps:$4 sm:$0xff]  }
  0xe2   :  { %3416 = vmatpush2.bf16.msra.mxu0 %v5124_v8  ;;  %v5192_v8 = vld [vmem:[#allocation4 + $0xc84] ss:$16 sps:$4 sm:$0xff]  }
  0xe3   :  { %3459 = vmatpush2.bf16.msra.mxu1 %v5127_v9  ;;  %3417 = vmatprep.subr.bf16.mxu0 %v5132_v10  ;;  %v5195_v9 = vld [vmem:[#allocation4 + $0xe84] ss:$16 sps:$4 sm:$0xff]   ;;  %v5190_v10 = vld [vmem:[#allocation4 + $0xc80] ss:$16 sps:$4 sm:$0xff]  }
  0xe4   :  { %3460 = vmatprep.subr.bf16.mxu1 %v5135_v11  ;;  %v5193_v11 = vld [vmem:[#allocation4 + $0xe80] ss:$16 sps:$4 sm:$0xff]  }
  0xe6   :  { %3418 = vmatpush2.bf16.msra.mxu0 %v5130_v14  ;;  %v5198_v14 = vld [vmem:[#allocation4 + $0xc64] ss:$16 sps:$4 sm:$0xff]  }
  0xe7   :  { %3461 = vmatpush2.bf16.msra.mxu1 %v5133_v15  ;;  %3419 = vmatprep.subr.bf16.mxu0 %v5138_v16  ;;  %v5201_v15 = vld [vmem:[#allocation4 + $0xe64] ss:$16 sps:$4 sm:$0xff]   ;;  %v5196_v16 = vld [vmem:[#allocation4 + $0xc60] ss:$16 sps:$4 sm:$0xff]  }
  0xe8   :  { %3462 = vmatprep.subr.bf16.mxu1 %v5141_v17  ;;  %v5199_v17 = vld [vmem:[#allocation4 + $0xe60] ss:$16 sps:$4 sm:$0xff]  }
  0xea   :  { %3420 = vmatpush2.bf16.msra.mxu0 %v5136_v18  ;;  %v5204_v18 = vld [vmem:[#allocation4 + $0xc44] ss:$16 sps:$4 sm:$0xff]  }
  0xeb   :  { %3463 = vmatpush2.bf16.msra.mxu1 %v5139_v19  ;;  %3421 = vmatprep.subr.bf16.mxu0 %v5144_v20  ;;  %v5207_v19 = vld [vmem:[#allocation4 + $0xe44] ss:$16 sps:$4 sm:$0xff]   ;;  %v5202_v20 = vld [vmem:[#allocation4 + $0xc40] ss:$16 sps:$4 sm:$0xff]  }
  0xec   :  { %3464 = vmatprep.subr.bf16.mxu1 %v5147_v21  ;;  %v5205_v21 = vld [vmem:[#allocation4 + $0xe40] ss:$16 sps:$4 sm:$0xff]  }
  0xee   :  { %3422 = vmatpush2.bf16.msra.mxu0 %v5142_v22  ;;  %v5210_v22 = vld [vmem:[#allocation4 + $0xc24] ss:$16 sps:$4 sm:$0xff]  }
  0xef   :  { %3465 = vmatpush2.bf16.msra.mxu1 %v5145_v23  ;;  %3423 = vmatprep.subr.bf16.mxu0 %v5150_v24  ;;  %v5213_v23 = vld [vmem:[#allocation4 + $0xe24] ss:$16 sps:$4 sm:$0xff]   ;;  %v5208_v24 = vld [vmem:[#allocation4 + $0xc20] ss:$16 sps:$4 sm:$0xff]  }
  0xf0   :  { %3466 = vmatprep.subr.bf16.mxu1 %v5153_v25  ;;  %v5211_v25 = vld [vmem:[#allocation4 + $0xe20] ss:$16 sps:$4 sm:$0xff]  }
  0xf2   :  { %3424 = vmatpush2.bf16.msra.mxu0 %v5148_v26  ;;  %v5216_v26 = vld [vmem:[#allocation4 + $0xc04] ss:$16 sps:$4 sm:$0xff]  }
  0xf3   :  { %3467 = vmatpush2.bf16.msra.mxu1 %v5151_v27  ;;  %3425 = vmatprep.subr.bf16.mxu0 %v5156_v30  ;;  %v5219_v27 = vld [vmem:[#allocation4 + $0xe04] ss:$16 sps:$4 sm:$0xff]   ;;  %v5214_v30 = vld [vmem:[#allocation4 + $0xc00] ss:$16 sps:$4 sm:$0xff]  }
  0xf4   :  { %3468 = vmatprep.subr.bf16.mxu1 %v5159_v31  ;;  %v5217_v31 = vld [vmem:[#allocation4 + $0xe00] ss:$16 sps:$4 sm:$0xff]  }
  0xf6   :  { %3426 = vmatpush2.bf16.msra.mxu0 %v5154_v32  ;;  %v5222_v32 = vld [vmem:[#allocation4 + $0xde4] ss:$16 sps:$4 sm:$0xff]  }
  0xf7   :  { %3469 = vmatpush2.bf16.msra.mxu1 %v5157_v33  ;;  %3427 = vmatprep.subr.bf16.mxu0 %v5162_v34  ;;  %v5225_v33 = vld [vmem:[#allocation4 + $0xfe4] ss:$16 sps:$4 sm:$0xff]   ;;  %v5220_v34 = vld [vmem:[#allocation4 + $0xde0] ss:$16 sps:$4 sm:$0xff]  }
  0xf8   :  { %3470 = vmatprep.subr.bf16.mxu1 %v5165_v35  ;;  %v5223_v35 = vld [vmem:[#allocation4 + $0xfe0] ss:$16 sps:$4 sm:$0xff]  }
  0xfa   :  { %3428 = vmatpush2.bf16.msra.mxu0 %v5160_v36  ;;  %v5228_v36 = vld [vmem:[#allocation4 + $0xdc4] ss:$16 sps:$4 sm:$0xff]  }
  0xfb   :  { %3471 = vmatpush2.bf16.msra.mxu1 %v5163_v37  ;;  %3429 = vmatprep.subr.bf16.mxu0 %v5168_v38  ;;  %v5231_v37 = vld [vmem:[#allocation4 + $0xfc4] ss:$16 sps:$4 sm:$0xff]   ;;  %v5226_v38 = vld [vmem:[#allocation4 + $0xdc0] ss:$16 sps:$4 sm:$0xff]  }
  0xfc   :  { %3472 = vmatprep.subr.bf16.mxu1 %v5171_v39  ;;  %v5229_v39 = vld [vmem:[#allocation4 + $0xfc0] ss:$16 sps:$4 sm:$0xff]  }
  0xfe   :  { %3430 = vmatpush2.bf16.msra.mxu0 %v5166_v41  ;;  %v5234_v41 = vld [vmem:[#allocation4 + $0xda4] ss:$16 sps:$4 sm:$0xff]  }
  0xff   :  { %3473 = vmatpush2.bf16.msra.mxu1 %v5169_v42  ;;  %3485 = vmatprep.subr.bf16.mxu0 %v5174_v50  ;;  %v5237_v42 = vld [vmem:[#allocation4 + $0xfa4] ss:$16 sps:$4 sm:$0xff]   ;;  %v5238_v50 = vld [vmem:[#allocation4 + $0xd80] ss:$16 sps:$4 sm:$0xff]  }
 0x100   :  { %3528 = vmatprep.subr.bf16.mxu1 %v5177_v51  ;;  %v5241_v51 = vld [vmem:[#allocation4 + $0xf80] ss:$16 sps:$4 sm:$0xff]  }
 0x101   :  { %3432 = vmatmul.mubr.bf16.vlgmr.msra.gmra.mxu0 %v5876_v58 }
 0x102   :  { %3475 = vmatmul.mubr.bf16.vlgmr.msra.gmra.mxu1 %v5878_v59  ;;  %3486 = vmatpush1.bf16.msra.mxu0 %v5172_v55  ;;  %v5249_v55 = vld [vmem:[#allocation4 + $0xf64] ss:$16 sps:$4 sm:$0xff]  }
 0x103   :  { %3529 = vmatpush1.bf16.msra.mxu1 %v5175_v61  ;;  %3487 = vmatprep.subr.bf16.mxu0 %v5180_v62  ;;  %v5255_v61 = vld [vmem:[#allocation4 + $0xf44] ss:$16 sps:$4 sm:$0xff]   ;;  %v5250_v62 = vld [vmem:[#allocation4 + $0xd40] ss:$16 sps:$4 sm:$0xff]  }
 0x104   :  { %3530 = vmatprep.subr.bf16.mxu1 %v5183_v63  ;;  %3517 = vmatprep.mubr.bf16.mxu0 %v5880_v0  ;;  %v5253_v63 = vld [vmem:[#allocation4 + $0xf40] ss:$16 sps:$4 sm:$0xff]  }
 0x105   :  { %3560 = vmatprep.mubr.bf16.mxu1 %v5882_v1 }
 0x106   :  { %3488 = vmatpush1.bf16.msra.mxu0 %v5178_v2  ;;  %v5258_v2 = vld [vmem:[#allocation4 + $0xd24] ss:$16 sps:$4 sm:$0xff]  }
 0x107   :  { %3531 = vmatpush1.bf16.msra.mxu1 %v5181_v3  ;;  %3489 = vmatprep.subr.bf16.mxu0 %v5186_v4  ;;  %v5261_v3 = vld [vmem:[#allocation4 + $0xf24] ss:$16 sps:$4 sm:$0xff]   ;;  %v5256_v4 = vld [vmem:[#allocation4 + $0xd20] ss:$16 sps:$4 sm:$0xff]  }
 0x108   :  { %3532 = vmatprep.subr.bf16.mxu1 %v5189_v5  ;;  %v5259_v5 = vld [vmem:[#allocation4 + $0xf20] ss:$16 sps:$4 sm:$0xff]  }
 0x10a   :  { %3490 = vmatpush1.bf16.msra.mxu0 %v5184_v6  ;;  %v5264_v6 = vld [vmem:[#allocation4 + $0xd04] ss:$16 sps:$4 sm:$0xff]  }
 0x10b   :  { %3533 = vmatpush1.bf16.msra.mxu1 %v5187_v7  ;;  %3491 = vmatprep.subr.bf16.mxu0 %v5192_v8  ;;  %v5267_v7 = vld [vmem:[#allocation4 + $0xf04] ss:$16 sps:$4 sm:$0xff]   ;;  %v5262_v8 = vld [vmem:[#allocation4 + $0xd00] ss:$16 sps:$4 sm:$0xff]  }
 0x10c   :  { %3534 = vmatprep.subr.bf16.mxu1 %v5195_v9  ;;  %v5265_v9 = vld [vmem:[#allocation4 + $0xf00] ss:$16 sps:$4 sm:$0xff]  }
 0x10e   :  { %3492 = vmatpush1.bf16.msra.mxu0 %v5190_v10  ;;  %v97_v10 = vld [vmem:[#allocation2 + $0x60] sm:$0xff] }
 0x10f   :  { %3535 = vmatpush1.bf16.msra.mxu1 %v5193_v11  ;;  %3493 = vmatprep.subr.bf16.mxu0 %v5198_v14  ;;  %v113_v11 = vld [vmem:[#allocation2 + $0xe0] sm:$0xff]  ;;  %v99_v14 = vld [vmem:[#allocation2 + $0x70] sm:$0xff] }
 0x110   :  { %3536 = vmatprep.subr.bf16.mxu1 %v5201_v15  ;;  %v115_v15 = vld [vmem:[#allocation2 + $0xf0] sm:$0xff] }
 0x112   :  { %3494 = vmatpush1.bf16.msra.mxu0 %v5196_v16  ;;  %v5270_v16 = vld [vmem:[#allocation4 + $0xec] ss:$16 sps:$4 sm:$0xff]  }
 0x113   :  { %3537 = vmatpush1.bf16.msra.mxu1 %v5199_v17  ;;  %3495 = vmatprep.subr.bf16.mxu0 %v5204_v18  ;;  %v5273_v17 = vld [vmem:[#allocation4 + $0x2ec] ss:$16 sps:$4 sm:$0xff]   ;;  %v5888_v18 = vpack.c.bf16 %v113_v11, %v97_v10  ;;  %v5334_v10 = vld [vmem:[#allocation4 + $0x188] ss:$16 sps:$4 sm:$0xff]  }
 0x114   :  { %3538 = vmatprep.subr.bf16.mxu1 %v5207_v19  ;;  %v5890_v19 = vpack.c.bf16 %v115_v15, %v99_v14  ;;  %v5337_v11 = vld [vmem:[#allocation4 + $0x388] ss:$16 sps:$4 sm:$0xff]   ;;  %v5342_v14 = vld [vmem:[#allocation4 + $0x16c] ss:$16 sps:$4 sm:$0xff]  }
 0x115   :  { %v5345_v15 = vld [vmem:[#allocation4 + $0x36c] ss:$16 sps:$4 sm:$0xff]  }
 0x116   :  { %3496 = vmatpush1.bf16.msra.mxu0 %v5202_v20  ;;  %v5268_v20 = vld [vmem:[#allocation4 + $0xe8] ss:$16 sps:$4 sm:$0xff]  }
 0x117   :  { %3539 = vmatpush1.bf16.msra.mxu1 %v5205_v21  ;;  %3497 = vmatprep.subr.bf16.mxu0 %v5210_v22  ;;  %v5271_v21 = vld [vmem:[#allocation4 + $0x2e8] ss:$16 sps:$4 sm:$0xff]   ;;  %v5276_v22 = vld [vmem:[#allocation4 + $0xcc] ss:$16 sps:$4 sm:$0xff]  }
 0x118   :  { %3540 = vmatprep.subr.bf16.mxu1 %v5213_v23  ;;  %v5279_v23 = vld [vmem:[#allocation4 + $0x2cc] ss:$16 sps:$4 sm:$0xff]  }
 0x11a   :  { %3498 = vmatpush1.bf16.msra.mxu0 %v5208_v24  ;;  %v5274_v24 = vld [vmem:[#allocation4 + $0xc8] ss:$16 sps:$4 sm:$0xff]  }
 0x11b   :  { %3541 = vmatpush1.bf16.msra.mxu1 %v5211_v25  ;;  %3499 = vmatprep.subr.bf16.mxu0 %v5216_v26  ;;  %v5277_v25 = vld [vmem:[#allocation4 + $0x2c8] ss:$16 sps:$4 sm:$0xff]   ;;  %v5282_v26 = vld [vmem:[#allocation4 + $0xac] ss:$16 sps:$4 sm:$0xff]  }
 0x11c   :  { %3542 = vmatprep.subr.bf16.mxu1 %v5219_v27  ;;  %v5285_v27 = vld [vmem:[#allocation4 + $0x2ac] ss:$16 sps:$4 sm:$0xff]  }
 0x11e   :  { %3500 = vmatpush1.bf16.msra.mxu0 %v5214_v30  ;;  %v5280_v30 = vld [vmem:[#allocation4 + $0xa8] ss:$16 sps:$4 sm:$0xff]  }
 0x11f   :  { %3543 = vmatpush1.bf16.msra.mxu1 %v5217_v31  ;;  %3501 = vmatprep.subr.bf16.mxu0 %v5222_v32  ;;  %v5283_v31 = vld [vmem:[#allocation4 + $0x2a8] ss:$16 sps:$4 sm:$0xff]   ;;  %v5288_v32 = vld [vmem:[#allocation4 + $0x8c] ss:$16 sps:$4 sm:$0xff]  }
 0x120   :  { %3544 = vmatprep.subr.bf16.mxu1 %v5225_v33  ;;  %v5291_v33 = vld [vmem:[#allocation4 + $0x28c] ss:$16 sps:$4 sm:$0xff]  }
 0x122   :  { %3502 = vmatpush2.bf16.msra.mxu0 %v5220_v34  ;;  %v5286_v34 = vld [vmem:[#allocation4 + $0x88] ss:$16 sps:$4 sm:$0xff]  }
 0x123   :  { %3545 = vmatpush2.bf16.msra.mxu1 %v5223_v35  ;;  %3503 = vmatprep.subr.bf16.mxu0 %v5228_v36  ;;  %v5289_v35 = vld [vmem:[#allocation4 + $0x288] ss:$16 sps:$4 sm:$0xff]   ;;  %v5294_v36 = vld [vmem:[#allocation4 + $0x6c] ss:$16 sps:$4 sm:$0xff]  }
 0x124   :  { %3546 = vmatprep.subr.bf16.mxu1 %v5231_v37  ;;  %v5297_v37 = vld [vmem:[#allocation4 + $0x26c] ss:$16 sps:$4 sm:$0xff]  }
 0x126   :  { %3504 = vmatpush2.bf16.msra.mxu0 %v5226_v38  ;;  %v5292_v38 = vld [vmem:[#allocation4 + $0x68] ss:$16 sps:$4 sm:$0xff]  }
 0x127   :  { %3547 = vmatpush2.bf16.msra.mxu1 %v5229_v39  ;;  %3505 = vmatprep.subr.bf16.mxu0 %v5234_v41  ;;  %v5303_v39 = vld [vmem:[#allocation4 + $0x24c] ss:$16 sps:$4 sm:$0xff]   ;;  %v5298_v41 = vld [vmem:[#allocation4 + $0x48] ss:$16 sps:$4 sm:$0xff]  }
 0x128   :  { %3548 = vmatprep.subr.bf16.mxu1 %v5237_v42  ;;  %v5301_v42 = vld [vmem:[#allocation4 + $0x248] ss:$16 sps:$4 sm:$0xff]  }
 0x12a   :  { %3506 = vmatpush2.bf16.msra.mxu0 %v5232_v43  ;;  %v5306_v43 = vld [vmem:[#allocation4 + $0x2c] ss:$16 sps:$4 sm:$0xff]  }
 0x12b   :  { %3549 = vmatpush2.bf16.msra.mxu1 %v5235_v44  ;;  %3507 = vmatprep.subr.bf16.mxu0 %v5240_v48  ;;  %v5309_v44 = vld [vmem:[#allocation4 + $0x22c] ss:$16 sps:$4 sm:$0xff]   ;;  %v5304_v48 = vld [vmem:[#allocation4 + $0x28] ss:$16 sps:$4 sm:$0xff]  }
 0x12c   :  { %3550 = vmatprep.subr.bf16.mxu1 %v5243_v49  ;;  %v5307_v49 = vld [vmem:[#allocation4 + $0x228] ss:$16 sps:$4 sm:$0xff]  }
 0x12e   :  { %3508 = vmatpush2.bf16.msra.mxu0 %v5238_v50  ;;  %v5312_v50 = vld [vmem:[#allocation4 + $0xc] ss:$16 sps:$4 sm:$0xff]  }
 0x12f   :  { %3551 = vmatpush2.bf16.msra.mxu1 %v5241_v51  ;;  %3509 = vmatprep.subr.bf16.mxu0 %v5246_v52  ;;  %v5315_v51 = vld [vmem:[#allocation4 + $0x20c] ss:$16 sps:$4 sm:$0xff]   ;;  %v5310_v52 = vld [vmem:[#allocation4 + $0x8] ss:$16 sps:$4 sm:$0xff]  }
 0x130   :  { %3552 = vmatprep.subr.bf16.mxu1 %v5249_v55  ;;  %v5313_v55 = vld [vmem:[#allocation4 + $0x208] ss:$16 sps:$4 sm:$0xff]  }
 0x132   :  { %3510 = vmatpush2.bf16.msra.mxu0 %v5244_v56  ;;  %v5318_v56 = vld [vmem:[#allocation4 + $0x1ec] ss:$16 sps:$4 sm:$0xff]  }
 0x133   :  { %3553 = vmatpush2.bf16.msra.mxu1 %v5247_v57  ;;  %3511 = vmatprep.subr.bf16.mxu0 %v5252_v60  ;;  %v5321_v57 = vld [vmem:[#allocation4 + $0x3ec] ss:$16 sps:$4 sm:$0xff]   ;;  %v5316_v60 = vld [vmem:[#allocation4 + $0x1e8] ss:$16 sps:$4 sm:$0xff]  }
 0x134   :  { %3554 = vmatprep.subr.bf16.mxu1 %v5255_v61  ;;  %v5319_v61 = vld [vmem:[#allocation4 + $0x3e8] ss:$16 sps:$4 sm:$0xff]  }
 0x136   :  { %3512 = vmatpush2.bf16.msra.mxu0 %v5250_v62  ;;  %v5324_v62 = vld [vmem:[#allocation4 + $0x1cc] ss:$16 sps:$4 sm:$0xff]  }
 0x137   :  { %3555 = vmatpush2.bf16.msra.mxu1 %v5253_v63  ;;  %3513 = vmatprep.subr.bf16.mxu0 %v5258_v2  ;;  %v5327_v63 = vld [vmem:[#allocation4 + $0x3cc] ss:$16 sps:$4 sm:$0xff]   ;;  %v5322_v2 = vld [vmem:[#allocation4 + $0x1c8] ss:$16 sps:$4 sm:$0xff]  }
 0x138   :  { %3556 = vmatprep.subr.bf16.mxu1 %v5261_v3  ;;  %v5325_v3 = vld [vmem:[#allocation4 + $0x3c8] ss:$16 sps:$4 sm:$0xff]  }
 0x13a   :  { %3514 = vmatpush2.bf16.msra.mxu0 %v5256_v4  ;;  %v5330_v4 = vld [vmem:[#allocation4 + $0x1ac] ss:$16 sps:$4 sm:$0xff]  }
 0x13b   :  { %3557 = vmatpush2.bf16.msra.mxu1 %v5259_v5  ;;  %3515 = vmatprep.subr.bf16.mxu0 %v5264_v6  ;;  %v5333_v5 = vld [vmem:[#allocation4 + $0x3ac] ss:$16 sps:$4 sm:$0xff]   ;;  %v5328_v6 = vld [vmem:[#allocation4 + $0x1a8] ss:$16 sps:$4 sm:$0xff]  }
 0x13c   :  { %3558 = vmatprep.subr.bf16.mxu1 %v5267_v7  ;;  %v5331_v7 = vld [vmem:[#allocation4 + $0x3a8] ss:$16 sps:$4 sm:$0xff]  }
 0x13e   :  { %3516 = vmatpush2.bf16.msra.mxu0 %v5262_v8  ;;  %v5336_v8 = vld [vmem:[#allocation4 + $0x18c] ss:$16 sps:$4 sm:$0xff]  }
 0x13f   :  { %3559 = vmatpush2.bf16.msra.mxu1 %v5265_v9  ;;  %3571 = vmatprep.subr.bf16.mxu0 %v5270_v16  ;;  %v5339_v9 = vld [vmem:[#allocation4 + $0x38c] ss:$16 sps:$4 sm:$0xff]   ;;  %v5340_v16 = vld [vmem:[#allocation4 + $0x168] ss:$16 sps:$4 sm:$0xff]  }
 0x140   :  { %3614 = vmatprep.subr.bf16.mxu1 %v5273_v17  ;;  %v5343_v17 = vld [vmem:[#allocation4 + $0x368] ss:$16 sps:$4 sm:$0xff]  }
 0x141   :  { %3518 = vmatmul.mubr.bf16.vlgmr.msra.gmra.mxu0 %v5888_v18 }
 0x142   :  { %3561 = vmatmul.mubr.bf16.vlgmr.msra.gmra.mxu1 %v5890_v19  ;;  %3572 = vmatpush1.bf16.msra.mxu0 %v5268_v20  ;;  %v5348_v20 = vld [vmem:[#allocation4 + $0x14c] ss:$16 sps:$4 sm:$0xff]  }
 0x143   :  { %3615 = vmatpush1.bf16.msra.mxu1 %v5271_v21  ;;  %3573 = vmatprep.subr.bf16.mxu0 %v5276_v22  ;;  %v5351_v21 = vld [vmem:[#allocation4 + $0x34c] ss:$16 sps:$4 sm:$0xff]   ;;  %v5346_v22 = vld [vmem:[#allocation4 + $0x148] ss:$16 sps:$4 sm:$0xff]  }
 0x144   :  { %3616 = vmatprep.subr.bf16.mxu1 %v5279_v23  ;;  %3603 = vmatprep.mubr.bf16.mxu0 %v5846_v53  ;;  %v5295_v53 = vld [vmem:[#allocation4 + $0x268] ss:$16 sps:$4 sm:$0xff]  }
 0x145   :  { %3646 = vmatprep.mubr.bf16.mxu1 %v5848_v54  ;;  %v5300_v54 = vld [vmem:[#allocation4 + $0x4c] ss:$16 sps:$4 sm:$0xff]   ;;  %v5349_v23 = vld [vmem:[#allocation4 + $0x348] ss:$16 sps:$4 sm:$0xff]  }
 0x146   :  { %3574 = vmatpush1.bf16.msra.mxu0 %v5274_v24  ;;  %v5354_v24 = vld [vmem:[#allocation4 + $0x12c] ss:$16 sps:$4 sm:$0xff]  }
 0x147   :  { %3617 = vmatpush1.bf16.msra.mxu1 %v5277_v25  ;;  %3575 = vmatprep.subr.bf16.mxu0 %v5282_v26  ;;  %v5357_v25 = vld [vmem:[#allocation4 + $0x32c] ss:$16 sps:$4 sm:$0xff]   ;;  %v5352_v26 = vld [vmem:[#allocation4 + $0x128] ss:$16 sps:$4 sm:$0xff]  }
 0x148   :  { %3618 = vmatprep.subr.bf16.mxu1 %v5285_v27  ;;  %v5355_v27 = vld [vmem:[#allocation4 + $0x328] ss:$16 sps:$4 sm:$0xff]  }
 0x14a   :  { %3576 = vmatpush1.bf16.msra.mxu0 %v5280_v30  ;;  %v5360_v30 = vld [vmem:[#allocation4 + $0x10c] ss:$16 sps:$4 sm:$0xff]  }
 0x14b   :  { %3619 = vmatpush1.bf16.msra.mxu1 %v5283_v31  ;;  %3577 = vmatprep.subr.bf16.mxu0 %v5288_v32  ;;  %v5363_v31 = vld [vmem:[#allocation4 + $0x30c] ss:$16 sps:$4 sm:$0xff]   ;;  %v5358_v32 = vld [vmem:[#allocation4 + $0x108] ss:$16 sps:$4 sm:$0xff]  }
 0x14c   :  { %3620 = vmatprep.subr.bf16.mxu1 %v5291_v33  ;;  %v5361_v33 = vld [vmem:[#allocation4 + $0x308] ss:$16 sps:$4 sm:$0xff]  }
 0x14e   :  { %3578 = vmatpush1.bf16.msra.mxu0 %v5286_v34  ;;  %v5366_v34 = vld [vmem:[#allocation4 + $0x4ec] ss:$16 sps:$4 sm:$0xff]  }
 0x14f   :  { %3621 = vmatpush1.bf16.msra.mxu1 %v5289_v35  ;;  %3579 = vmatprep.subr.bf16.mxu0 %v5294_v36  ;;  %v5369_v35 = vld [vmem:[#allocation4 + $0x6ec] ss:$16 sps:$4 sm:$0xff]   ;;  %v5364_v36 = vld [vmem:[#allocation4 + $0x4e8] ss:$16 sps:$4 sm:$0xff]  }
 0x150   :  { %3622 = vmatprep.subr.bf16.mxu1 %v5297_v37  ;;  %v5367_v37 = vld [vmem:[#allocation4 + $0x6e8] ss:$16 sps:$4 sm:$0xff]  }
 0x152   :  { %3580 = vmatpush1.bf16.msra.mxu0 %v5292_v38  ;;  %v5372_v38 = vld [vmem:[#allocation4 + $0x4cc] ss:$16 sps:$4 sm:$0xff]  }
 0x153   :  { %3623 = vmatpush1.bf16.msra.mxu1 %v5295_v53  ;;  %3581 = vmatprep.subr.bf16.mxu0 %v5300_v54  ;;  %v5375_v53 = vld [vmem:[#allocation4 + $0x6cc] ss:$16 sps:$4 sm:$0xff]   ;;  %v5370_v54 = vld [vmem:[#allocation4 + $0x4c8] ss:$16 sps:$4 sm:$0xff]  }
 0x154   :  { %3624 = vmatprep.subr.bf16.mxu1 %v5303_v39  ;;  %v5373_v39 = vld [vmem:[#allocation4 + $0x6c8] ss:$16 sps:$4 sm:$0xff]  }
 0x156   :  { %3582 = vmatpush1.bf16.msra.mxu0 %v5298_v41  ;;  %v5378_v41 = vld [vmem:[#allocation4 + $0x4ac] ss:$16 sps:$4 sm:$0xff]  }
 0x157   :  { %3625 = vmatpush1.bf16.msra.mxu1 %v5301_v42  ;;  %3583 = vmatprep.subr.bf16.mxu0 %v5306_v43  ;;  %v5381_v42 = vld [vmem:[#allocation4 + $0x6ac] ss:$16 sps:$4 sm:$0xff]   ;;  %v5376_v43 = vld [vmem:[#allocation4 + $0x4a8] ss:$16 sps:$4 sm:$0xff]  }
 0x158   :  { %3626 = vmatprep.subr.bf16.mxu1 %v5309_v44  ;;  %v5379_v44 = vld [vmem:[#allocation4 + $0x6a8] ss:$16 sps:$4 sm:$0xff]  }
 0x15a   :  { %3584 = vmatpush1.bf16.msra.mxu0 %v5304_v48  ;;  %v5384_v48 = vld [vmem:[#allocation4 + $0x48c] ss:$16 sps:$4 sm:$0xff]  }
 0x15b   :  { %3627 = vmatpush1.bf16.msra.mxu1 %v5307_v49  ;;  %3585 = vmatprep.subr.bf16.mxu0 %v5312_v50  ;;  %v5382_v49 = vld [vmem:[#allocation4 + $0x488] ss:$16 sps:$4 sm:$0xff]   ;;  %v5390_v50 = vld [vmem:[#allocation4 + $0x46c] ss:$16 sps:$4 sm:$0xff]  }
 0x15c   :  { %3628 = vmatprep.subr.bf16.mxu1 %v5315_v51  ;;  %v5393_v51 = vld [vmem:[#allocation4 + $0x66c] ss:$16 sps:$4 sm:$0xff]  }
 0x15e   :  { %3586 = vmatpush1.bf16.msra.mxu0 %v5310_v52  ;;  %v5388_v52 = vld [vmem:[#allocation4 + $0x468] ss:$16 sps:$4 sm:$0xff]  }
 0x15f   :  { %3629 = vmatpush1.bf16.msra.mxu1 %v5313_v55  ;;  %3587 = vmatprep.subr.bf16.mxu0 %v5318_v56  ;;  %v5399_v55 = vld [vmem:[#allocation4 + $0x64c] ss:$16 sps:$4 sm:$0xff]   ;;  %v5394_v56 = vld [vmem:[#allocation4 + $0x448] ss:$16 sps:$4 sm:$0xff]  }
 0x160   :  { %3630 = vmatprep.subr.bf16.mxu1 %v5321_v57  ;;  %v5397_v57 = vld [vmem:[#allocation4 + $0x648] ss:$16 sps:$4 sm:$0xff]  }
 0x162   :  { %3588 = vmatpush2.bf16.msra.mxu0 %v5316_v60  ;;  %v5402_v60 = vld [vmem:[#allocation4 + $0x42c] ss:$16 sps:$4 sm:$0xff]  }
 0x163   :  { %3631 = vmatpush2.bf16.msra.mxu1 %v5319_v61  ;;  %3589 = vmatprep.subr.bf16.mxu0 %v5324_v62  ;;  %v5405_v61 = vld [vmem:[#allocation4 + $0x62c] ss:$16 sps:$4 sm:$0xff]   ;;  %v5400_v62 = vld [vmem:[#allocation4 + $0x428] ss:$16 sps:$4 sm:$0xff]  }
 0x164   :  { %3632 = vmatprep.subr.bf16.mxu1 %v5327_v63  ;;  %v5403_v63 = vld [vmem:[#allocation4 + $0x628] ss:$16 sps:$4 sm:$0xff]  }
 0x166   :  { %3590 = vmatpush2.bf16.msra.mxu0 %v5322_v2  ;;  %v5408_v2 = vld [vmem:[#allocation4 + $0x40c] ss:$16 sps:$4 sm:$0xff]  }
 0x167   :  { %3633 = vmatpush2.bf16.msra.mxu1 %v5325_v3  ;;  %3591 = vmatprep.subr.bf16.mxu0 %v5330_v4  ;;  %v5411_v3 = vld [vmem:[#allocation4 + $0x60c] ss:$16 sps:$4 sm:$0xff]   ;;  %v5406_v4 = vld [vmem:[#allocation4 + $0x408] ss:$16 sps:$4 sm:$0xff]  }
 0x168   :  { %3634 = vmatprep.subr.bf16.mxu1 %v5333_v5  ;;  %v5409_v5 = vld [vmem:[#allocation4 + $0x608] ss:$16 sps:$4 sm:$0xff]  }
 0x16a   :  { %3592 = vmatpush2.bf16.msra.mxu0 %v5328_v6  ;;  %v5414_v6 = vld [vmem:[#allocation4 + $0x5ec] ss:$16 sps:$4 sm:$0xff]  }
 0x16b   :  { %3635 = vmatpush2.bf16.msra.mxu1 %v5331_v7  ;;  %3593 = vmatprep.subr.bf16.mxu0 %v5336_v8  ;;  %v5417_v7 = vld [vmem:[#allocation4 + $0x7ec] ss:$16 sps:$4 sm:$0xff]   ;;  %v5412_v8 = vld [vmem:[#allocation4 + $0x5e8] ss:$16 sps:$4 sm:$0xff]  }
 0x16c   :  { %3636 = vmatprep.subr.bf16.mxu1 %v5339_v9  ;;  %v5415_v9 = vld [vmem:[#allocation4 + $0x7e8] ss:$16 sps:$4 sm:$0xff]  }
 0x16e   :  { %3594 = vmatpush2.bf16.msra.mxu0 %v5334_v10  ;;  %v5420_v10 = vld [vmem:[#allocation4 + $0x5cc] ss:$16 sps:$4 sm:$0xff]  }
 0x16f   :  { %3637 = vmatpush2.bf16.msra.mxu1 %v5337_v11  ;;  %3595 = vmatprep.subr.bf16.mxu0 %v5342_v14  ;;  %v5423_v11 = vld [vmem:[#allocation4 + $0x7cc] ss:$16 sps:$4 sm:$0xff]   ;;  %v5418_v14 = vld [vmem:[#allocation4 + $0x5c8] ss:$16 sps:$4 sm:$0xff]  }
 0x170   :  { %3638 = vmatprep.subr.bf16.mxu1 %v5345_v15  ;;  %v5421_v15 = vld [vmem:[#allocation4 + $0x7c8] ss:$16 sps:$4 sm:$0xff]  }
 0x172   :  { %3596 = vmatpush2.bf16.msra.mxu0 %v5340_v16  ;;  %v5426_v16 = vld [vmem:[#allocation4 + $0x5ac] ss:$16 sps:$4 sm:$0xff]  }
 0x173   :  { %3639 = vmatpush2.bf16.msra.mxu1 %v5343_v17  ;;  %3597 = vmatprep.subr.bf16.mxu0 %v5348_v20  ;;  %v5429_v17 = vld [vmem:[#allocation4 + $0x7ac] ss:$16 sps:$4 sm:$0xff]   ;;  %v5424_v20 = vld [vmem:[#allocation4 + $0x5a8] ss:$16 sps:$4 sm:$0xff]  }
 0x174   :  { %3640 = vmatprep.subr.bf16.mxu1 %v5351_v21  ;;  %v5427_v21 = vld [vmem:[#allocation4 + $0x7a8] ss:$16 sps:$4 sm:$0xff]  }
 0x176   :  { %3598 = vmatpush2.bf16.msra.mxu0 %v5346_v22  ;;  %v5432_v22 = vld [vmem:[#allocation4 + $0x58c] ss:$16 sps:$4 sm:$0xff]  }
 0x177   :  { %3641 = vmatpush2.bf16.msra.mxu1 %v5349_v23  ;;  %3599 = vmatprep.subr.bf16.mxu0 %v5354_v24  ;;  %v5435_v23 = vld [vmem:[#allocation4 + $0x78c] ss:$16 sps:$4 sm:$0xff]   ;;  %v5430_v24 = vld [vmem:[#allocation4 + $0x588] ss:$16 sps:$4 sm:$0xff]  }
 0x178   :  { %3642 = vmatprep.subr.bf16.mxu1 %v5357_v25  ;;  %v5433_v25 = vld [vmem:[#allocation4 + $0x788] ss:$16 sps:$4 sm:$0xff]  }
 0x17a   :  { %3600 = vmatpush2.bf16.msra.mxu0 %v5352_v26  ;;  %v5438_v26 = vld [vmem:[#allocation4 + $0x56c] ss:$16 sps:$4 sm:$0xff]  }
 0x17b   :  { %3643 = vmatpush2.bf16.msra.mxu1 %v5355_v27  ;;  %3601 = vmatprep.subr.bf16.mxu0 %v5360_v30  ;;  %v5441_v27 = vld [vmem:[#allocation4 + $0x76c] ss:$16 sps:$4 sm:$0xff]   ;;  %v5436_v30 = vld [vmem:[#allocation4 + $0x568] ss:$16 sps:$4 sm:$0xff]  }
 0x17c   :  { %3644 = vmatprep.subr.bf16.mxu1 %v5363_v31  ;;  %v5439_v31 = vld [vmem:[#allocation4 + $0x768] ss:$16 sps:$4 sm:$0xff]  }
 0x17e   :  { %3602 = vmatpush2.bf16.msra.mxu0 %v5358_v32  ;;  %v5444_v32 = vld [vmem:[#allocation4 + $0x54c] ss:$16 sps:$4 sm:$0xff]  }
 0x17f   :  { %3645 = vmatpush2.bf16.msra.mxu1 %v5361_v33  ;;  %3657 = vmatprep.subr.bf16.mxu0 %v5366_v34  ;;  %v5447_v33 = vld [vmem:[#allocation4 + $0x74c] ss:$16 sps:$4 sm:$0xff]   ;;  %v5442_v34 = vld [vmem:[#allocation4 + $0x548] ss:$16 sps:$4 sm:$0xff]  }
 0x180   :  { %3700 = vmatprep.subr.bf16.mxu1 %v5369_v35  ;;  %v5445_v35 = vld [vmem:[#allocation4 + $0x748] ss:$16 sps:$4 sm:$0xff]  }
 0x181   :  { %3604 = vmatmul.mubr.bf16.vlgmr.msra.gmra.mxu0 %v5852_v12  ;;  %v5387_v12 = vld [vmem:[#allocation4 + $0x68c] ss:$16 sps:$4 sm:$0xff]  }
 0x182   :  { %3647 = vmatmul.mubr.bf16.vlgmr.msra.gmra.mxu1 %v5854_v13  ;;  %3658 = vmatpush1.bf16.msra.mxu0 %v5364_v36  ;;  %v5385_v13 = vld [vmem:[#allocation4 + $0x688] ss:$16 sps:$4 sm:$0xff]   ;;  %v5450_v36 = vld [vmem:[#allocation4 + $0x52c] ss:$16 sps:$4 sm:$0xff]  }
 0x183   :  { %3701 = vmatpush1.bf16.msra.mxu1 %v5367_v37  ;;  %3659 = vmatprep.subr.bf16.mxu0 %v5372_v38  ;;  %v5453_v37 = vld [vmem:[#allocation4 + $0x72c] ss:$16 sps:$4 sm:$0xff]   ;;  %v5448_v38 = vld [vmem:[#allocation4 + $0x528] ss:$16 sps:$4 sm:$0xff]  }
 0x184   :  { %3702 = vmatprep.subr.bf16.mxu1 %v5375_v53  ;;  %3689 = vmatprep.mubr.bf16.mxu0 %v5858_v45  ;;  %v5391_v45 = vld [vmem:[#allocation4 + $0x668] ss:$16 sps:$4 sm:$0xff]  }
 0x185   :  { %3732 = vmatprep.mubr.bf16.mxu1 %v5860_v47  ;;  %v5396_v47 = vld [vmem:[#allocation4 + $0x44c] ss:$16 sps:$4 sm:$0xff]   ;;  %v5451_v53 = vld [vmem:[#allocation4 + $0x728] ss:$16 sps:$4 sm:$0xff]  }
 0x186   :  { %3660 = vmatpush1.bf16.msra.mxu0 %v5370_v54  ;;  %v5456_v54 = vld [vmem:[#allocation4 + $0x50c] ss:$16 sps:$4 sm:$0xff]  }
 0x187   :  { %3703 = vmatpush1.bf16.msra.mxu1 %v5373_v39  ;;  %3661 = vmatprep.subr.bf16.mxu0 %v5378_v41  ;;  %v5459_v39 = vld [vmem:[#allocation4 + $0x70c] ss:$16 sps:$4 sm:$0xff]   ;;  %v5454_v41 = vld [vmem:[#allocation4 + $0x508] ss:$16 sps:$4 sm:$0xff]  }
 0x188   :  { %3704 = vmatprep.subr.bf16.mxu1 %v5381_v42  ;;  %v5457_v42 = vld [vmem:[#allocation4 + $0x708] ss:$16 sps:$4 sm:$0xff]  }
 0x18a   :  { %3662 = vmatpush1.bf16.msra.mxu0 %v5376_v43  ;;  %v5462_v43 = vld [vmem:[#allocation4 + $0x8ec] ss:$16 sps:$4 sm:$0xff]  }
 0x18b   :  { %3705 = vmatpush1.bf16.msra.mxu1 %v5379_v44  ;;  %3663 = vmatprep.subr.bf16.mxu0 %v5384_v48  ;;  %v5465_v44 = vld [vmem:[#allocation4 + $0xaec] ss:$16 sps:$4 sm:$0xff]   ;;  %v5460_v48 = vld [vmem:[#allocation4 + $0x8e8] ss:$16 sps:$4 sm:$0xff]  }
 0x18c   :  { %3706 = vmatprep.subr.bf16.mxu1 %v5387_v12  ;;  %v5463_v12 = vld [vmem:[#allocation4 + $0xae8] ss:$16 sps:$4 sm:$0xff]  }
 0x18e   :  { %3664 = vmatpush1.bf16.msra.mxu0 %v5382_v49  ;;  %v5468_v49 = vld [vmem:[#allocation4 + $0x8cc] ss:$16 sps:$4 sm:$0xff]  }
 0x18f   :  { %3707 = vmatpush1.bf16.msra.mxu1 %v5385_v13  ;;  %3665 = vmatprep.subr.bf16.mxu0 %v5390_v50  ;;  %v5471_v13 = vld [vmem:[#allocation4 + $0xacc] ss:$16 sps:$4 sm:$0xff]   ;;  %v5466_v50 = vld [vmem:[#allocation4 + $0x8c8] ss:$16 sps:$4 sm:$0xff]  }
 0x190   :  { %3708 = vmatprep.subr.bf16.mxu1 %v5393_v51  ;;  %v5469_v51 = vld [vmem:[#allocation4 + $0xac8] ss:$16 sps:$4 sm:$0xff]  }
 0x192   :  { %3666 = vmatpush1.bf16.msra.mxu0 %v5388_v52  ;;  %v5474_v52 = vld [vmem:[#allocation4 + $0x8ac] ss:$16 sps:$4 sm:$0xff]  }
 0x193   :  { %3709 = vmatpush1.bf16.msra.mxu1 %v5391_v45  ;;  %3667 = vmatprep.subr.bf16.mxu0 %v5396_v47  ;;  %v5477_v45 = vld [vmem:[#allocation4 + $0xaac] ss:$16 sps:$4 sm:$0xff]   ;;  %v5472_v47 = vld [vmem:[#allocation4 + $0x8a8] ss:$16 sps:$4 sm:$0xff]  }
 0x194   :  { %3710 = vmatprep.subr.bf16.mxu1 %v5399_v55  ;;  %v5475_v55 = vld [vmem:[#allocation4 + $0xaa8] ss:$16 sps:$4 sm:$0xff]  }
 0x196   :  { %3668 = vmatpush1.bf16.msra.mxu0 %v5394_v56  ;;  %v5478_v56 = vld [vmem:[#allocation4 + $0x888] ss:$16 sps:$4 sm:$0xff]  }
 0x197   :  { %3711 = vmatpush1.bf16.msra.mxu1 %v5397_v57  ;;  %3669 = vmatprep.subr.bf16.mxu0 %v5402_v60  ;;  %v5481_v57 = vld [vmem:[#allocation4 + $0xa88] ss:$16 sps:$4 sm:$0xff]   ;;  %v5486_v60 = vld [vmem:[#allocation4 + $0x86c] ss:$16 sps:$4 sm:$0xff]  }
 0x198   :  { %3712 = vmatprep.subr.bf16.mxu1 %v5405_v61  ;;  %v5489_v61 = vld [vmem:[#allocation4 + $0xa6c] ss:$16 sps:$4 sm:$0xff]  }
 0x19a   :  { %3670 = vmatpush1.bf16.msra.mxu0 %v5400_v62  ;;  %v5492_v62 = vld [vmem:[#allocation4 + $0x84c] ss:$16 sps:$4 sm:$0xff]  }
 0x19b   :  { %3713 = vmatpush1.bf16.msra.mxu1 %v5403_v63  ;;  %3671 = vmatprep.subr.bf16.mxu0 %v5408_v2  ;;  %v5495_v63 = vld [vmem:[#allocation4 + $0xa4c] ss:$16 sps:$4 sm:$0xff]   ;;  %v5490_v2 = vld [vmem:[#allocation4 + $0x848] ss:$16 sps:$4 sm:$0xff]  }
 0x19c   :  { %3714 = vmatprep.subr.bf16.mxu1 %v5411_v3  ;;  %v5493_v3 = vld [vmem:[#allocation4 + $0xa48] ss:$16 sps:$4 sm:$0xff]  }
 0x19e   :  { %3672 = vmatpush1.bf16.msra.mxu0 %v5406_v4  ;;  %v5498_v4 = vld [vmem:[#allocation4 + $0x82c] ss:$16 sps:$4 sm:$0xff]  }
 0x19f   :  { %3715 = vmatpush1.bf16.msra.mxu1 %v5409_v5  ;;  %3673 = vmatprep.subr.bf16.mxu0 %v5414_v6  ;;  %v5501_v5 = vld [vmem:[#allocation4 + $0xa2c] ss:$16 sps:$4 sm:$0xff]   ;;  %v5496_v6 = vld [vmem:[#allocation4 + $0x828] ss:$16 sps:$4 sm:$0xff]  }
 0x1a0   :  { %3716 = vmatprep.subr.bf16.mxu1 %v5417_v7  ;;  %v5499_v7 = vld [vmem:[#allocation4 + $0xa28] ss:$16 sps:$4 sm:$0xff]  }
 0x1a2   :  { %3674 = vmatpush2.bf16.msra.mxu0 %v5412_v8  ;;  %v5504_v8 = vld [vmem:[#allocation4 + $0x80c] ss:$16 sps:$4 sm:$0xff]  }
 0x1a3   :  { %3717 = vmatpush2.bf16.msra.mxu1 %v5415_v9  ;;  %3675 = vmatprep.subr.bf16.mxu0 %v5420_v10  ;;  %v5507_v9 = vld [vmem:[#allocation4 + $0xa0c] ss:$16 sps:$4 sm:$0xff]   ;;  %v5502_v10 = vld [vmem:[#allocation4 + $0x808] ss:$16 sps:$4 sm:$0xff]  }
 0x1a4   :  { %3718 = vmatprep.subr.bf16.mxu1 %v5423_v11  ;;  %v5505_v11 = vld [vmem:[#allocation4 + $0xa08] ss:$16 sps:$4 sm:$0xff]  }
 0x1a6   :  { %3676 = vmatpush2.bf16.msra.mxu0 %v5418_v14  ;;  %v5510_v14 = vld [vmem:[#allocation4 + $0x9ec] ss:$16 sps:$4 sm:$0xff]  }
 0x1a7   :  { %3719 = vmatpush2.bf16.msra.mxu1 %v5421_v15  ;;  %3677 = vmatprep.subr.bf16.mxu0 %v5426_v16  ;;  %v5513_v15 = vld [vmem:[#allocation4 + $0xbec] ss:$16 sps:$4 sm:$0xff]   ;;  %v5508_v16 = vld [vmem:[#allocation4 + $0x9e8] ss:$16 sps:$4 sm:$0xff]  }
 0x1a8   :  { %3720 = vmatprep.subr.bf16.mxu1 %v5429_v17  ;;  %v5511_v17 = vld [vmem:[#allocation4 + $0xbe8] ss:$16 sps:$4 sm:$0xff]  }
 0x1aa   :  { %3678 = vmatpush2.bf16.msra.mxu0 %v5424_v20  ;;  %v5516_v20 = vld [vmem:[#allocation4 + $0x9cc] ss:$16 sps:$4 sm:$0xff]  }
 0x1ab   :  { %3721 = vmatpush2.bf16.msra.mxu1 %v5427_v21  ;;  %3679 = vmatprep.subr.bf16.mxu0 %v5432_v22  ;;  %v5519_v21 = vld [vmem:[#allocation4 + $0xbcc] ss:$16 sps:$4 sm:$0xff]   ;;  %v5514_v22 = vld [vmem:[#allocation4 + $0x9c8] ss:$16 sps:$4 sm:$0xff]  }
 0x1ac   :  { %3722 = vmatprep.subr.bf16.mxu1 %v5435_v23  ;;  %v5517_v23 = vld [vmem:[#allocation4 + $0xbc8] ss:$16 sps:$4 sm:$0xff]  }
 0x1ae   :  { %3680 = vmatpush2.bf16.msra.mxu0 %v5430_v24  ;;  %v5522_v24 = vld [vmem:[#allocation4 + $0x9ac] ss:$16 sps:$4 sm:$0xff]  }
 0x1af   :  { %3723 = vmatpush2.bf16.msra.mxu1 %v5433_v25  ;;  %3681 = vmatprep.subr.bf16.mxu0 %v5438_v26  ;;  %v5525_v25 = vld [vmem:[#allocation4 + $0xbac] ss:$16 sps:$4 sm:$0xff]   ;;  %v5520_v26 = vld [vmem:[#allocation4 + $0x9a8] ss:$16 sps:$4 sm:$0xff]  }
 0x1b0   :  { %3724 = vmatprep.subr.bf16.mxu1 %v5441_v27  ;;  %v5523_v27 = vld [vmem:[#allocation4 + $0xba8] ss:$16 sps:$4 sm:$0xff]  }
 0x1b2   :  { %3682 = vmatpush2.bf16.msra.mxu0 %v5436_v30  ;;  %v5528_v30 = vld [vmem:[#allocation4 + $0x98c] ss:$16 sps:$4 sm:$0xff]  }
 0x1b3   :  { %3725 = vmatpush2.bf16.msra.mxu1 %v5439_v31  ;;  %3683 = vmatprep.subr.bf16.mxu0 %v5444_v32  ;;  %v5531_v31 = vld [vmem:[#allocation4 + $0xb8c] ss:$16 sps:$4 sm:$0xff]   ;;  %v5526_v32 = vld [vmem:[#allocation4 + $0x988] ss:$16 sps:$4 sm:$0xff]  }
 0x1b4   :  { %3726 = vmatprep.subr.bf16.mxu1 %v5447_v33  ;;  %v5529_v33 = vld [vmem:[#allocation4 + $0xb88] ss:$16 sps:$4 sm:$0xff]  }
 0x1b6   :  { %3684 = vmatpush2.bf16.msra.mxu0 %v5442_v34  ;;  %v5534_v34 = vld [vmem:[#allocation4 + $0x96c] ss:$16 sps:$4 sm:$0xff]  }
 0x1b7   :  { %3727 = vmatpush2.bf16.msra.mxu1 %v5445_v35  ;;  %3685 = vmatprep.subr.bf16.mxu0 %v5450_v36  ;;  %v5537_v35 = vld [vmem:[#allocation4 + $0xb6c] ss:$16 sps:$4 sm:$0xff]   ;;  %v5532_v36 = vld [vmem:[#allocation4 + $0x968] ss:$16 sps:$4 sm:$0xff]  }
 0x1b8   :  { %3728 = vmatprep.subr.bf16.mxu1 %v5453_v37  ;;  %v5535_v37 = vld [vmem:[#allocation4 + $0xb68] ss:$16 sps:$4 sm:$0xff]  }
 0x1ba   :  { %3686 = vmatpush2.bf16.msra.mxu0 %v5448_v38  ;;  %v5540_v38 = vld [vmem:[#allocation4 + $0x94c] ss:$16 sps:$4 sm:$0xff]  }
 0x1bb   :  { %3729 = vmatpush2.bf16.msra.mxu1 %v5451_v53  ;;  %3687 = vmatprep.subr.bf16.mxu0 %v5456_v54  ;;  %v5543_v53 = vld [vmem:[#allocation4 + $0xb4c] ss:$16 sps:$4 sm:$0xff]   ;;  %v5538_v54 = vld [vmem:[#allocation4 + $0x948] ss:$16 sps:$4 sm:$0xff]  }
 0x1bc   :  { %3730 = vmatprep.subr.bf16.mxu1 %v5459_v39  ;;  %v5541_v39 = vld [vmem:[#allocation4 + $0xb48] ss:$16 sps:$4 sm:$0xff]  }
 0x1be   :  { %3688 = vmatpush2.bf16.msra.mxu0 %v5454_v41  ;;  %v5546_v41 = vld [vmem:[#allocation4 + $0x92c] ss:$16 sps:$4 sm:$0xff]  }
 0x1bf   :  { %3731 = vmatpush2.bf16.msra.mxu1 %v5457_v42  ;;  %3743 = vmatprep.subr.bf16.mxu0 %v5462_v43  ;;  %v5549_v42 = vld [vmem:[#allocation4 + $0xb2c] ss:$16 sps:$4 sm:$0xff]   ;;  %v5544_v43 = vld [vmem:[#allocation4 + $0x928] ss:$16 sps:$4 sm:$0xff]  }
 0x1c0   :  { %3786 = vmatprep.subr.bf16.mxu1 %v5465_v44  ;;  %v5547_v44 = vld [vmem:[#allocation4 + $0xb28] ss:$16 sps:$4 sm:$0xff]  }
 0x1c1   :  { %3690 = vmatmul.mubr.bf16.vlgmr.msra.gmra.mxu0 %v5864_v28  ;;  %v5480_v28 = vld [vmem:[#allocation4 + $0x88c] ss:$16 sps:$4 sm:$0xff]  }
 0x1c2   :  { %3733 = vmatmul.mubr.bf16.vlgmr.msra.gmra.mxu1 %v5866_v29  ;;  %3744 = vmatpush1.bf16.msra.mxu0 %v5460_v48  ;;  %v5483_v29 = vld [vmem:[#allocation4 + $0xa8c] ss:$16 sps:$4 sm:$0xff]  }
 0x1c3   :  { %3787 = vmatpush1.bf16.msra.mxu1 %v5463_v12  ;;  %3745 = vmatprep.subr.bf16.mxu0 %v5468_v49  ;;  %v5552_v48 = vld [vmem:[#allocation4 + $0x90c] ss:$16 sps:$4 sm:$0xff]   ;;  %v5550_v49 = vld [vmem:[#allocation4 + $0x908] ss:$16 sps:$4 sm:$0xff]  }
 0x1c4   :  { %3788 = vmatprep.subr.bf16.mxu1 %v5471_v13  ;;  %3775 = vmatprep.mubr.bf16.mxu0 %v5870_v40  ;;  %v5484_v40 = vld [vmem:[#allocation4 + $0x868] ss:$16 sps:$4 sm:$0xff]   ;;  %v5555_v12 = vld [vmem:[#allocation4 + $0xb0c] ss:$16 sps:$4 sm:$0xff]  }
 0x1c5   :  { %3818 = vmatprep.mubr.bf16.mxu1 %v5872_v46  ;;  %v5487_v46 = vld [vmem:[#allocation4 + $0xa68] ss:$16 sps:$4 sm:$0xff]  }
 0x1c6   :  { %3746 = vmatpush1.bf16.msra.mxu0 %v5466_v50  ;;  %v5553_v13 = vld [vmem:[#allocation4 + $0xb08] ss:$16 sps:$4 sm:$0xff]   ;;  %v5904_v50 = vpop.f32.mrf.mxu0 }
 0x1c7   :  { %3789 = vmatpush1.bf16.msra.mxu1 %v5469_v51  ;;  %3747 = vmatprep.subr.bf16.mxu0 %v5474_v52  ;;  %v5558_v51 = vld [vmem:[#allocation4 + $0xcec] ss:$16 sps:$4 sm:$0xff]  }
 0x1c8   :  { %3790 = vmatprep.subr.bf16.mxu1 %v5477_v45  ;;  %v5561_v52 = vld [vmem:[#allocation4 + $0xeec] ss:$16 sps:$4 sm:$0xff]   ;;  %v5556_v45 = vld [vmem:[#allocation4 + $0xce8] ss:$16 sps:$4 sm:$0xff]  }
 0x1ca   :  { %3748 = vmatpush1.bf16.msra.mxu0 %v5472_v47  ;;  %v5559_v47 = vld [vmem:[#allocation4 + $0xee8] ss:$16 sps:$4 sm:$0xff]  }
 0x1cb   :  { %3791 = vmatpush1.bf16.msra.mxu1 %v5475_v55  ;;  %3749 = vmatprep.subr.bf16.mxu0 %v5480_v28  ;;  %v5906_v55 = vpop.f32.mrf.mxu0  ;;  %v5564_v28 = vld [vmem:[#allocation4 + $0xccc] ss:$16 sps:$4 sm:$0xff]  }
 0x1cc   :  { %3792 = vmatprep.subr.bf16.mxu1 %v5483_v29  ;;  %v5567_v29 = vld [vmem:[#allocation4 + $0xecc] ss:$16 sps:$4 sm:$0xff]  }
 0x1ce   :  { %3750 = vmatpush1.bf16.msra.mxu0 %v5478_v56  ;;  %v5908_v56 = vpop.f32.mrf.mxu1 }
 0x1cf   :  { %3793 = vmatpush1.bf16.msra.mxu1 %v5481_v57  ;;  %3751 = vmatprep.subr.bf16.mxu0 %v5486_v60  ;;  %v5562_v57 = vld [vmem:[#allocation4 + $0xcc8] ss:$16 sps:$4 sm:$0xff]  }
 0x1d0   :  { %3794 = vmatprep.subr.bf16.mxu1 %v5489_v61  ;;  %v5565_v60 = vld [vmem:[#allocation4 + $0xec8] ss:$16 sps:$4 sm:$0xff]   ;;  %v5912_v61 = vpop.f32.mrf.mxu0 }
 0x1d2   :  { %3752 = vmatpush1.bf16.msra.mxu0 %v5484_v40  ;;  %v5570_v40 = vld [vmem:[#allocation4 + $0xcac] ss:$16 sps:$4 sm:$0xff]  }
 0x1d3   :  { %3795 = vmatpush1.bf16.msra.mxu1 %v5487_v46  ;;  %3753 = vmatprep.subr.bf16.mxu0 %v5492_v62  ;;  %v5573_v46 = vld [vmem:[#allocation4 + $0xeac] ss:$16 sps:$4 sm:$0xff]   ;;  %v5916_v62 = vpop.f32.mrf.mxu1 }
 0x1d4   :  { %3796 = vmatprep.subr.bf16.mxu1 %v5495_v63  ;;  %v5918_v63 = vpop.f32.mrf.mxu0 }
 0x1d6   :  { %3754 = vmatpush1.bf16.msra.mxu0 %v5490_v2  ;;  %v5576_v2 = vld [vmem:[#allocation4 + $0xc8c] ss:$16 sps:$4 sm:$0xff]  }
 0x1d7   :  { %3797 = vmatpush1.bf16.msra.mxu1 %v5493_v3  ;;  %3755 = vmatprep.subr.bf16.mxu0 %v5498_v4  ;;  %v5579_v3 = vld [vmem:[#allocation4 + $0xe8c] ss:$16 sps:$4 sm:$0xff]   ;;  %v5920_v4 = vpop.f32.mrf.mxu1 }
 0x1d8   :  { %3798 = vmatprep.subr.bf16.mxu1 %v5501_v5  ;;  %v5922_v5 = vpop.f32.mrf.mxu0 }
 0x1da   :  { %3756 = vmatpush1.bf16.msra.mxu0 %v5496_v6  ;;  %v5582_v6 = vld [vmem:[#allocation4 + $0xc6c] ss:$16 sps:$4 sm:$0xff]  }
 0x1db   :  { %3799 = vmatpush1.bf16.msra.mxu1 %v5499_v7  ;;  %3757 = vmatprep.subr.bf16.mxu0 %v5504_v8  ;;  %v5585_v7 = vld [vmem:[#allocation4 + $0xe6c] ss:$16 sps:$4 sm:$0xff]   ;;  %v5924_v8 = vpop.f32.mrf.mxu1 }
 0x1dc   :  { %3800 = vmatprep.subr.bf16.mxu1 %v5507_v9  ;;  %v5926_v9 = vpop.f32.mrf.mxu0 }
 0x1de   :  { %3758 = vmatpush1.bf16.msra.mxu0 %v5502_v10  ;;  %v5580_v10 = vld [vmem:[#allocation4 + $0xc68] ss:$16 sps:$4 sm:$0xff]  }
 0x1df   :  { %3801 = vmatpush1.bf16.msra.mxu1 %v5505_v11  ;;  %3759 = vmatprep.subr.bf16.mxu0 %v5510_v14  ;;  %v5583_v11 = vld [vmem:[#allocation4 + $0xe68] ss:$16 sps:$4 sm:$0xff]   ;;  %v5928_v14 = vpop.f32.mrf.mxu1 }
 0x1e0   :  { %3802 = vmatprep.subr.bf16.mxu1 %v5513_v15  ;;  %v5588_v15 = vld [vmem:[#allocation4 + $0xc4c] ss:$16 sps:$4 sm:$0xff]  }
 0x1e2   :  { %3760 = vmatpush2.bf16.msra.mxu0 %v5508_v16  ;;  %v5591_v16 = vld [vmem:[#allocation4 + $0xe4c] ss:$16 sps:$4 sm:$0xff]  }
 0x1e3   :  { %3803 = vmatpush2.bf16.msra.mxu1 %v5511_v17  ;;  %3761 = vmatprep.subr.bf16.mxu0 %v5516_v20  ;;  %v5930_v17 = vpop.f32.mrf.mxu0  ;;  %v5586_v20 = vld [vmem:[#allocation4 + $0xc48] ss:$16 sps:$4 sm:$0xff]  }
 0x1e4   :  { %3804 = vmatprep.subr.bf16.mxu1 %v5519_v21  ;;  %v5589_v21 = vld [vmem:[#allocation4 + $0xe48] ss:$16 sps:$4 sm:$0xff]  }
 0x1e6   :  { %3762 = vmatpush2.bf16.msra.mxu0 %v5514_v22  ;;  %v5932_v22 = vpop.f32.mrf.mxu1 }
 0x1e7   :  { %3805 = vmatpush2.bf16.msra.mxu1 %v5517_v23  ;;  %3763 = vmatprep.subr.bf16.mxu0 %v5522_v24  ;;  %v5594_v23 = vld [vmem:[#allocation4 + $0xc2c] ss:$16 sps:$4 sm:$0xff]  }
 0x1e8   :  { %3806 = vmatprep.subr.bf16.mxu1 %v5525_v25  ;;  %v5597_v24 = vld [vmem:[#allocation4 + $0xe2c] ss:$16 sps:$4 sm:$0xff]   ;;  %v647_v25 = vlaneseq }
 0x1ea   :  { %3764 = vmatpush2.bf16.msra.mxu0 %v5520_v26  ;;  %v3353_v26 = vpop.f32.mrf.mxu0 }
 0x1eb   :  { %3807 = vmatpush2.bf16.msra.mxu1 %v5523_v27  ;;  %3765 = vmatprep.subr.bf16.mxu0 %v5528_v30  ;;  %v5592_v27 = vld [vmem:[#allocation4 + $0xc28] ss:$16 sps:$4 sm:$0xff]  }
 0x1ec   :  { %3808 = vmatprep.subr.bf16.mxu1 %v5531_v31  ;;  %v5595_v30 = vld [vmem:[#allocation4 + $0xe28] ss:$16 sps:$4 sm:$0xff]   ;;  %v5934_v31 = vpop.f32.mrf.mxu1 }
 0x1ee   :  { %3766 = vmatpush2.bf16.msra.mxu0 %v5526_v32  ;;  %v5936_v32 = vpop.f32.mrf.mxu0 }
 0x1ef   :  { %3809 = vmatpush2.bf16.msra.mxu1 %v5529_v33  ;;  %3767 = vmatprep.subr.bf16.mxu0 %v5534_v34  ;;  %v5600_v33 = vld [vmem:[#allocation4 + $0xc0c] ss:$16 sps:$4 sm:$0xff]  }
 0x1f0   :  { %3810 = vmatprep.subr.bf16.mxu1 %v5537_v35  ;;  %v5603_v34 = vld [vmem:[#allocation4 + $0xe0c] ss:$16 sps:$4 sm:$0xff]   ;;  %v5938_v35 = vshrl.u32 %v647_v25, 7  ;;  %v5628_v25 = vld [vmem:[#allocation4 + $0xd68] ss:$16 sps:$4 sm:$0xff]  }
 0x1f2   :  { %3768 = vmatpush2.bf16.msra.mxu0 %v5532_v36  ;;  %v5598_v36 = vld [vmem:[#allocation4 + $0xc08] ss:$16 sps:$4 sm:$0xff]  }
 0x1f3   :  { %3811 = vmatpush2.bf16.msra.mxu1 %v5535_v37  ;;  %3769 = vmatprep.subr.bf16.mxu0 %v5540_v38  ;;  %v5601_v37 = vld [vmem:[#allocation4 + $0xe08] ss:$16 sps:$4 sm:$0xff]   ;;  %v3396_v38 = vpop.f32.mrf.mxu1 }
 0x1f4   :  { %3812 = vmatprep.subr.bf16.mxu1 %v5543_v53  ;;  %v5940_v53 = vpop.f32.mrf.mxu0 }
 0x1f6   :  { %3770 = vmatpush2.bf16.msra.mxu0 %v5538_v54  ;;  %v5606_v54 = vld [vmem:[#allocation4 + $0xdec] ss:$16 sps:$4 sm:$0xff]  }
 0x1f7   :  { %3813 = vmatpush2.bf16.msra.mxu1 %v5541_v39  ;;  %3771 = vmatprep.subr.bf16.mxu0 %v5546_v41  ;;  %v5609_v39 = vld [vmem:[#allocation4 + $0xfec] ss:$16 sps:$4 sm:$0xff]   ;;  %v653_v41 = vsub.s32 1, %v5938_v35 }
 0x1f8   :  { %3814 = vmatprep.subr.bf16.mxu1 %v5549_v42  ;;  %v5943_v42 = vld [vmem:[#allocation6] sm:$0xf] }
 0x1fa   :  { %3772 = vmatpush2.bf16.msra.mxu0 %v5544_v43  ;;  %v5945_v43 = vpop.f32.mrf.mxu1 }
 0x1fb   :  { %3815 = vmatpush2.bf16.msra.mxu1 %v5547_v44  ;;  %3773 = vmatprep.subr.bf16.mxu0 %v5552_v48  ;;  %v5604_v44 = vld [vmem:[#allocation4 + $0xde8] ss:$16 sps:$4 sm:$0xff]  }
 0x1fc   :  { %3816 = vmatprep.subr.bf16.mxu1 %v5555_v12  ;;  %v5607_v48 = vld [vmem:[#allocation4 + $0xfe8] ss:$16 sps:$4 sm:$0xff]   ;;  %v5947_v12 = vpop.f32.mrf.mxu0 }
 0x1fe   :  { %3774 = vmatpush2.bf16.msra.mxu0 %v5550_v49  ;;  %v5612_v49 = vld [vmem:[#allocation4 + $0xdcc] ss:$16 sps:$4 sm:$0xff]  }
 0x1ff   :  { %3817 = vmatpush2.bf16.msra.mxu1 %v5553_v13  ;;  %3829 = vmatprep.subr.bf16.mxu0 %v5558_v51  ;;  %v5615_v13 = vld [vmem:[#allocation4 + $0xfcc] ss:$16 sps:$4 sm:$0xff]   ;;  %v654_v51 = vrot.slane %v5943_v42, %v653_v41 }
 0x200   :  { %3872 = vmatprep.subr.bf16.mxu1 %v5561_v52  ;;  %v3478_v52 = vpop.f32.mrf.mxu1 }
 0x201   :  { %3776 = vmatmul.mubr.bf16.vlgmr.msra.gmra.mxu0 %v5876_v58  ;;  %v5568_v58 = vld [vmem:[#allocation4 + $0xca8] ss:$16 sps:$4 sm:$0xff]  }
 0x202   :  { %3819 = vmatmul.mubr.bf16.vlgmr.msra.gmra.mxu1 %v5878_v59  ;;  %3830 = vmatpush1.bf16.msra.mxu0 %v5556_v45  ;;  %v5571_v59 = vld [vmem:[#allocation4 + $0xea8] ss:$16 sps:$4 sm:$0xff]   ;;  %v3268_v45 = vadd.f32 %v5918_v63, %v654_v51 }
 0x203   :  { %3873 = vmatpush1.bf16.msra.mxu1 %v5559_v47  ;;  %3831 = vmatprep.subr.bf16.mxu0 %v5564_v28  ;;  %v5610_v47 = vld [vmem:[#allocation4 + $0xdc8] ss:$16 sps:$4 sm:$0xff]  }
 0x204   :  { %3874 = vmatprep.subr.bf16.mxu1 %v5567_v29  ;;  %3861 = vmatprep.mubr.bf16.mxu0 %v5880_v0  ;;  %v5574_v0 = vld [vmem:[#allocation4 + $0xc88] ss:$16 sps:$4 sm:$0xff]   ;;  %v3439_v29 = vpop.f32.mrf.mxu0 }
 0x205   :  { %3904 = vmatprep.mubr.bf16.mxu1 %v5882_v1  ;;  %v5577_v1 = vld [vmem:[#allocation4 + $0xe88] ss:$16 sps:$4 sm:$0xff]  }
 0x206   :  { %3832 = vmatpush1.bf16.msra.mxu0 %v5562_v57  ;;  %v5613_v28 = vld [vmem:[#allocation4 + $0xfc8] ss:$16 sps:$4 sm:$0xff]   ;;  %v5618_v57 = vld [vmem:[#allocation4 + $0xdac] ss:$16 sps:$4 sm:$0xff]  }
 0x207   :  { %3875 = vmatpush1.bf16.msra.mxu1 %v5565_v60  ;;  %3833 = vmatprep.subr.bf16.mxu0 %v5570_v40  ;;  %v5621_v60 = vld [vmem:[#allocation4 + $0xfac] ss:$16 sps:$4 sm:$0xff]   ;;  %v3264_v40 = vadd.f32 %v5906_v55, %v654_v51  ;;  %v5616_v63 = vld [vmem:[#allocation4 + $0xda8] ss:$16 sps:$4 sm:$0xff]  }
 0x208   :  { %3876 = vmatprep.subr.bf16.mxu1 %v5573_v46  ;;  %v5952_v46 = vpop.f32.mrf.mxu1  ;;  %v5648_v51 = vld [vmem:[#allocation4 + $0xd0c] ss:$16 sps:$4 sm:$0xff]  }
 0x20a   :  { %3834 = vmatpush1.bf16.msra.mxu0 %v5568_v58  ;;  %v5954_v58 = vpop.f32.mrf.mxu0 }
 0x20b   :  { %3877 = vmatpush1.bf16.msra.mxu1 %v5571_v59  ;;  %3835 = vmatprep.subr.bf16.mxu0 %v5576_v2  ;;  %v3311_v59 = vadd.f32 %v5924_v8, %v3268_v45  ;;  %v5619_v2 = vld [vmem:[#allocation4 + $0xfa8] ss:$16 sps:$4 sm:$0xff]   ;;  %v5651_v45 = vld [vmem:[#allocation4 + $0xf0c] ss:$16 sps:$4 sm:$0xff]  }
 0x20c   :  { %3878 = vmatprep.subr.bf16.mxu1 %v5579_v3  ;;  %v5624_v3 = vld [vmem:[#allocation4 + $0xd8c] ss:$16 sps:$4 sm:$0xff]  }
 0x20e   :  { %3836 = vmatpush1.bf16.msra.mxu0 %v5574_v0  ;;  %v5627_v0 = vld [vmem:[#allocation4 + $0xf8c] ss:$16 sps:$4 sm:$0xff]  }
 0x20f   :  { %3879 = vmatpush1.bf16.msra.mxu1 %v5577_v1  ;;  %3837 = vmatprep.subr.bf16.mxu0 %v5582_v6  ;;  %v3307_v1 = vadd.f32 %v5916_v62, %v3264_v40  ;;  %v3354_v6 = vadd.f32 %v3353_v26, %v3311_v59 }
 0x210   :  { %3880 = vmatprep.subr.bf16.mxu1 %v5585_v7  ;;  %v3482_v7 = vpop.f32.mrf.mxu1 }
 0x211   :  { %v3350_v55 = vadd.f32 %v5926_v9, %v3307_v1  ;;  %v5631_v9 = vld [vmem:[#allocation4 + $0xf68] ss:$16 sps:$4 sm:$0xff]  }
 0x212   :  { %3838 = vmatpush1.bf16.msra.mxu0 %v5580_v10  ;;  %v3521_v10 = vpop.f32.mrf.mxu0  ;;  %v5959_v8 = vpop.f32.mrf.mxu1 }
 0x213   :  { %3881 = vmatpush1.bf16.msra.mxu1 %v5583_v11  ;;  %3839 = vmatprep.subr.bf16.mxu0 %v5588_v15  ;;  %v5622_v11 = vld [vmem:[#allocation4 + $0xd88] ss:$16 sps:$4 sm:$0xff]   ;;  %v3393_v62 = vadd.f32 %v5932_v22, %v3350_v55  ;;  %v5642_v22 = vld [vmem:[#allocation4 + $0xd2c] ss:$16 sps:$4 sm:$0xff]  }
 0x214   :  { %3882 = vmatprep.subr.bf16.mxu1 %v5591_v16  ;;  %v5625_v15 = vld [vmem:[#allocation4 + $0xf88] ss:$16 sps:$4 sm:$0xff]   ;;  %v5630_v16 = vld [vmem:[#allocation4 + $0xd6c] ss:$16 sps:$4 sm:$0xff]   ;;  %v3564_v26 = vpop.f32.mrf.mxu1 }
 0x216   :  { %3840 = vmatpush1.bf16.msra.mxu0 %v5586_v20  ;;  %v5633_v20 = vld [vmem:[#allocation4 + $0xf6c] ss:$16 sps:$4 sm:$0xff]  }
 0x217   :  { %3883 = vmatpush1.bf16.msra.mxu1 %v5589_v21  ;;  %3841 = vmatprep.subr.bf16.mxu0 %v5594_v23  ;;  %v3397_v21 = vadd.f32 %v3396_v38, %v3354_v6  ;;  %v5961_v23 = vpop.f32.mrf.mxu0  ;;  %v5637_v38 = vld [vmem:[#allocation4 + $0xf48] ss:$16 sps:$4 sm:$0xff]  }
 0x218   :  { %3884 = vmatprep.subr.bf16.mxu1 %v5597_v24  ;;  %v5655_v6 = vld [vmem:[#allocation7 + $0x30] sm:$0xff]  }
 0x219   :  { %v3440_v24 = vadd.f32 %v3439_v29, %v3397_v21  ;;  %v5646_v29 = vld [vmem:[#allocation4 + $0xd08] ss:$16 sps:$4 sm:$0xff]   ;;  %v5669_v21 = vld [vmem:[#allocation7 + $0xb8] sm:$0xff]  }
 0x21a   :  { %3842 = vmatpush1.bf16.msra.mxu0 %v5592_v27  ;;  %v5636_v27 = vld [vmem:[#allocation4 + $0xd4c] ss:$16 sps:$4 sm:$0xff]  }
 0x21b   :  { %3885 = vmatpush1.bf16.msra.mxu1 %v5595_v30  ;;  %3843 = vmatprep.subr.bf16.mxu0 %v5600_v33  ;;  %v5639_v30 = vld [vmem:[#allocation4 + $0xf4c] ss:$16 sps:$4 sm:$0xff]   ;;  %v3436_v33 = vadd.f32 %v5940_v53, %v3393_v62  ;;  %v5670_v62 = vld [vmem:[#allocation7 + $0xf0] sm:$0xff]  }
 0x21c   :  { %3886 = vmatprep.subr.bf16.mxu1 %v5603_v34  ;;  %v3525_v34 = vpop.f32.mrf.mxu0 }
 0x21d   :  { %v3479_v41 = vadd.f32 %v3478_v52, %v3436_v33  ;;  %v5652_v52 = vld [vmem:[#allocation7 + $0x78] sm:$0xff]  }
 0x21e   :  { %3844 = vmatpush1.bf16.msra.mxu0 %v5598_v36  ;;  %v3483_v36 = vadd.f32 %v3482_v7, %v3440_v24  ;;  %v5660_v24 = vld [vmem:[#allocation7 + $0x58] sm:$0xff]  }
 0x21f   :  { %3887 = vmatpush1.bf16.msra.mxu1 %v5601_v37  ;;  %3845 = vmatprep.subr.bf16.mxu0 %v5606_v54  ;;  %v5634_v37 = vld [vmem:[#allocation4 + $0xd48] ss:$16 sps:$4 sm:$0xff]   ;;  %v5965_v54 = vpop.f32.mrf.mxu1 }
 0x220   :  { %3888 = vmatprep.subr.bf16.mxu1 %v5609_v39  ;;  %v5645_v39 = vld [vmem:[#allocation4 + $0xf2c] ss:$16 sps:$4 sm:$0xff]  }
 0x221   :  { %v3568_v53 = vpop.f32.mrf.mxu1 }
 0x222   :  { %3846 = vmatpush2.bf16.msra.mxu0 %v5604_v44  ;;  %v3526_v44 = vadd.f32 %v3525_v34, %v3483_v36  ;;  %v5664_v34 = vld [vmem:[#allocation7 + $0x48] sm:$0xff]  }
 0x223   :  { %3889 = vmatpush2.bf16.msra.mxu1 %v5607_v48  ;;  %3847 = vmatprep.subr.bf16.mxu0 %v5612_v49  ;;  %v3522_v48 = vadd.f32 %v3521_v10, %v3479_v41  ;;  %v5640_v49 = vld [vmem:[#allocation4 + $0xd28] ss:$16 sps:$4 sm:$0xff]   ;;  %v5656_v10 = vld [vmem:[#allocation7 + $0x68] sm:$0xff]  }
 0x224   :  { %3890 = vmatprep.subr.bf16.mxu1 %v5615_v13  ;;  %v5643_v13 = vld [vmem:[#allocation4 + $0xf28] ss:$16 sps:$4 sm:$0xff]  }
 0x226   :  { %3848 = vmatpush2.bf16.msra.mxu0 %v5610_v47  ;;  %v3569_v47 = vadd.f32 %v3568_v53, %v3526_v44  ;;  %v5677_v44 = vld [vmem:[#allocation7 + $0x98] sm:$0xff]   ;;  %v5683_v53 = vld [vmem:[#allocation7 + $0x80] sm:$0xff]  }
 0x227   :  { %3891 = vmatpush2.bf16.msra.mxu1 %v5613_v28  ;;  %3849 = vmatprep.subr.bf16.mxu0 %v5618_v57  ;;  %v3565_v28 = vadd.f32 %v3564_v26, %v3522_v48  ;;  %v5649_v57 = vld [vmem:[#allocation4 + $0xf08] ss:$16 sps:$4 sm:$0xff]  }
 0x228   :  { %3892 = vmatprep.subr.bf16.mxu1 %v5621_v60  ;;  %v649_v60 = vsub.s32 0, %v5938_v35  ;;  %v3920_v40 = vmax.f32 %v3569_v47, 0.0  ;;  %v5662_v26 = vld [vmem:[#allocation7 + $0x50] sm:$0xff]  }
 0x229   :  { %v3916_v59 = vmax.f32 %v3565_v28, 0.0  ;;  %v5678_v48 = vld [vmem:[#allocation7 + $0xd0] sm:$0xff]  }
 0x22a   :  { %3850 = vmatpush2.bf16.msra.mxu0 %v5616_v63  ;;  %v5653_v63 = vld [vmem:[#allocation7 + $0x38] sm:$0xff]  }
 0x22b   :  { %3893 = vmatpush2.bf16.msra.mxu1 %v5619_v2  ;;  %3851 = vmatprep.subr.bf16.mxu0 %v5624_v3  ;;  %v650_v2 = vrot.slane %v5943_v42, %v649_v60  ;;  %v5654_v3 = vld [vmem:[#allocation7 + $0x70] sm:$0xff]  }
 0x22c   :  { %3894 = vmatprep.subr.bf16.mxu1 %v5627_v0  ;;  %v3924_v0 = vpack.c.bf16 %v3920_v40, %v3916_v59 }
 0x22d   :  { %v3266_v1 = vadd.f32 %v5912_v61, %v650_v2  ;;  %v3262_v7 = vadd.f32 %v5904_v50, %v650_v2  ;;  %v5658_v61 = vld [vmem:[#allocation7 + $0x60] sm:$0xff]  }
 0x22e   :  { %3852 = vmatpush2.bf16.msra.mxu0 %v5622_v11  ;;  %v5657_v11 = vld [vmem:[#allocation7 + $0x28] sm:$0xff]  }
 0x22f   :  { %3895 = vmatpush2.bf16.msra.mxu1 %v5625_v15  ;;  %3853 = vmatprep.subr.bf16.mxu0 %v5630_v16  ;;  %v3309_v55 = vadd.f32 %v5920_v4, %v3266_v1  ;;  %v3305_v15 = vadd.f32 %v5908_v56, %v3262_v7 }
 0x230   :  { %3896 = vmatprep.subr.bf16.mxu1 %v5633_v20  ;;  %v5668_v20 = vld [vmem:[#allocation7 + $0xf8] sm:$0xff]  }
 0x231   :  { %v3352_v16 = vadd.f32 %v5930_v17, %v3309_v55  ;;  %v5671_v17 = vld [vmem:[#allocation7 + $0xb0] sm:$0xff]  }
 0x232   :  { %3854 = vmatpush2.bf16.msra.mxu0 %v5628_v25  ;;  %v5661_v25 = vld [vmem:[#allocation7 + $0x18] sm:$0xff]  }
 0x233   :  { %3897 = vmatpush2.bf16.msra.mxu1 %v5631_v9  ;;  %3855 = vmatprep.subr.bf16.mxu0 %v5636_v27  ;;  %v3395_v50 = vadd.f32 %v5934_v31, %v3352_v16  ;;  %v5673_v31 = vld [vmem:[#allocation7 + $0xa8] sm:$0xff]  }
 0x234   :  { %3898 = vmatprep.subr.bf16.mxu1 %v5639_v30  ;;  %v5663_v30 = vld [vmem:[#allocation7 + $0x10] sm:$0xff]  }
 0x235   :  { %v3438_v56 = vadd.f32 %v5947_v12, %v3395_v50 }
 0x236   :  { %3856 = vmatpush2.bf16.msra.mxu0 %v5634_v37  ;;  %v5665_v37 = vld [vmem:[#allocation7 + $0x8] sm:$0xff]  }
 0x237   :  { %3899 = vmatpush2.bf16.msra.mxu1 %v5637_v38  ;;  %3857 = vmatprep.subr.bf16.mxu0 %v5642_v22  ;;  %v3481_v27 = vadd.f32 %v5952_v46, %v3438_v56  ;;  %v5666_v38 = vld [vmem:[#allocation7 + $0x40] sm:$0xff]  }
 0x238   :  { %3900 = vmatprep.subr.bf16.mxu1 %v5645_v39 }
 0x239   :  { %v3524_v33 = vadd.f32 %v5961_v23, %v3481_v27 }
 0x23a   :  { %3858 = vmatpush2.bf16.msra.mxu0 %v5640_v49  ;;  %v5679_v49 = vld [vmem:[#allocation7 + $0x90] sm:$0xff]  }
 0x23b   :  { %3901 = vmatpush2.bf16.msra.mxu1 %v5643_v13  ;;  %3859 = vmatprep.subr.bf16.mxu0 %v5648_v51  ;;  %v3567_v46 = vadd.f32 %v5965_v54, %v3524_v33  ;;  %v5680_v54 = vld [vmem:[#allocation7 + $0xc8] sm:$0xff]  }
 0x23c   :  { %3902 = vmatprep.subr.bf16.mxu1 %v5651_v45  ;;  %v5681_v13 = vld [vmem:[#allocation7 + $0x88] sm:$0xff]  }
 0x23d   :  { %v3919_v39 = vmax.f32 %v3567_v46, 0.0 }
 0x23e   :  { %3860 = vmatpush2.bf16.msra.mxu0 %v5646_v29 }
 0x23f   :  { %3903 = vmatpush2.bf16.msra.mxu1 %v5649_v57  ;;  %4829 = vmatprep.subr.bf16.mxu0 %v5652_v52 }
 0x240   :  { %4851 = vmatprep.subr.bf16.mxu1 %v5668_v20 }
 0x241   :  { %3862 = vmatmul.mubr.bf16.vlgmr.msra.gmra.mxu0 %v5888_v18  ;;  %v3348_v18 = vadd.f32 %v5922_v5, %v3305_v15  ;;  %v5672_v5 = vld [vmem:[#allocation7 + $0xe8] sm:$0xff]   ;;  %v3605_v51 = vpop.f32.mrf.mxu0 }
 0x242   :  { %3905 = vmatmul.mubr.bf16.vlgmr.msra.gmra.mxu1 %v5890_v19  ;;  %4830 = vmatpush3.bf16.msra.mxu0 %v5653_v63  ;;  %v5659_v19 = vld [vmem:[#allocation7 + $0x20] sm:$0xff]   ;;  %v3648_v45 = vpop.f32.mrf.mxu1 }
 0x243   :  { %4215 = vmatprep.mubr.bf16.mxu0 %v3924_v0  ;;  %4831 = vmatprep.subr.bf16.mxu0 %v5654_v3  ;;  %v3391_v4 = vadd.f32 %v5928_v14, %v3348_v18  ;;  %v5674_v14 = vld [vmem:[#allocation7 + $0xe0] sm:$0xff]   ;;  %v3607_v47 = vpop.f32.mrf.mxu0  ;;  %v661_v3 = vsub.s32 3, %v5938_v35  ;;  %v657_v0 = vsub.s32 2, %v5938_v35 }
 0x244   :  { %4852 = vmatpush3.bf16.msra.mxu1 %v5669_v21  ;;  %v3650_v28 = vpop.f32.mrf.mxu1 }
 0x245   :  { %4853 = vmatprep.subr.bf16.mxu1 %v5670_v62  ;;  %v3434_v9 = vadd.f32 %v5936_v32, %v3391_v4  ;;  %v5675_v32 = vld [vmem:[#allocation7 + $0xa0] sm:$0xff]   ;;  %v3609_v29 = vpop.f32.mrf.mxu0  ;;  %v662_v7 = vrot.slane %v5943_v42, %v661_v3 }
 0x246   :  { %4832 = vmatpush3.bf16.msra.mxu0 %v5655_v6  ;;  %v3652_v57 = vpop.f32.mrf.mxu1 }
 0x247   :  { %4833 = vmatprep.subr.bf16.mxu0 %v5656_v10  ;;  %v3477_v12 = vadd.f32 %v5945_v43, %v3434_v9  ;;  %v5667_v43 = vld [vmem:[#allocation7] sm:$0xff]   ;;  %v3611_v60 = vpop.f32.mrf.mxu0  ;;  %v658_v10 = vrot.slane %v5943_v42, %v657_v0  ;;  %v3608_v15 = vadd.f32 %v3607_v47, %v662_v7 }
 0x248   :  { %4854 = vmatpush3.bf16.msra.mxu1 %v5671_v17  ;;  %v3654_v52 = vpop.f32.mrf.mxu1  ;;  %v3612_v21 = vadd.f32 %v3611_v60, %v662_v7 }
 0x249   :  { %4855 = vmatprep.subr.bf16.mxu1 %v5672_v5  ;;  %v3520_v36 = vadd.f32 %v5954_v58, %v3477_v12  ;;  %v5676_v58 = vld [vmem:[#allocation7 + $0xd8] sm:$0xff]   ;;  %v3606_v16 = vadd.f32 %v3605_v51, %v658_v10  ;;  %v3651_v20 = vadd.f32 %v3650_v28, %v3608_v15 }
 0x24a   :  { %4834 = vmatpush3.bf16.msra.mxu0 %v5657_v11  ;;  %v3655_v17 = vadd.f32 %v3654_v52, %v3612_v21 }
 0x24b   :  { %4835 = vmatprep.subr.bf16.mxu0 %v5658_v61  ;;  %v3563_v22 = vadd.f32 %v5959_v8, %v3520_v36  ;;  %v5682_v8 = vld [vmem:[#allocation7 + $0xc0] sm:$0xff]   ;;  %v3649_v62 = vadd.f32 %v3648_v45, %v3606_v16 }
 0x24c   :  { %4856 = vmatpush3.bf16.msra.mxu1 %v5673_v31 }
 0x24d   :  { %4857 = vmatprep.subr.bf16.mxu1 %v5674_v14  ;;  %v3915_v23 = vmax.f32 %v3563_v22, 0.0 }
 0x24e   :  { %4836 = vmatpush3.bf16.msra.mxu0 %v5659_v19  ;;  %v3610_v19 = vadd.f32 %v3609_v29, %v658_v10 }
 0x24f   :  { %4837 = vmatprep.subr.bf16.mxu0 %v5660_v24  ;;  %v3923_v41 = vpack.c.bf16 %v3919_v39, %v3915_v23 }
 0x250   :  { %4858 = vmatpush3.bf16.msra.mxu1 %v5675_v32  ;;  %v3653_v4 = vadd.f32 %v3652_v57, %v3610_v19 }
 0x251   :  { %4859 = vmatprep.subr.bf16.mxu1 %v5676_v58 }
 0x252   :  { %4838 = vmatpush3.bf16.msra.mxu0 %v5661_v25 }
 0x253   :  { %4839 = vmatprep.subr.bf16.mxu0 %v5662_v26 }
 0x254   :  { %4860 = vmatpush3.bf16.msra.mxu1 %v5677_v44 }
 0x255   :  { %4861 = vmatprep.subr.bf16.mxu1 %v5678_v48 }
 0x256   :  { %4840 = vmatpush3.bf16.msra.mxu0 %v5663_v30 }
 0x257   :  { %4841 = vmatprep.subr.bf16.mxu0 %v5664_v34 }
 0x258   :  { %4862 = vmatpush3.bf16.msra.mxu1 %v5679_v49 }
 0x259   :  { %4863 = vmatprep.subr.bf16.mxu1 %v5680_v54 }
 0x25a   :  { %4842 = vmatpush3.bf16.msra.mxu0 %v5665_v37 }
 0x25b   :  { %4843 = vmatprep.subr.bf16.mxu0 %v5666_v38 }
 0x25c   :  { %4864 = vmatpush3.bf16.msra.mxu1 %v5681_v13 }
 0x25d   :  { %4865 = vmatprep.subr.bf16.mxu1 %v5682_v8 }
 0x25e   :  { %4844 = vmatpush3.bf16.msra.mxu0 %v5667_v43 }
 0x260   :  { %4866 = vmatpush3.bf16.msra.mxu1 %v5683_v53 }
 0x261   :  { %4216 = vmatmul.mubr.bf16.vlgmr.msra.gmra.mxu0 %v3923_v41 }
 0x281   :  { %v3691_v40 = vpop.f32.mrf.mxu0 }
 0x282   :  { %v3734_v59 = vpop.f32.mrf.mxu1  ;;  %v3692_v56 = vadd.f32 %v3691_v40, %v3649_v62 }
 0x283   :  { %v3693_v63 = vpop.f32.mrf.mxu0 }
 0x284   :  { %v3736_v2 = vpop.f32.mrf.mxu1  ;;  %v3694_v35 = vadd.f32 %v3693_v63, %v3651_v20  ;;  %v3735_v27 = vadd.f32 %v3734_v59, %v3692_v56 }
 0x285   :  { %v3695_v1 = vpop.f32.mrf.mxu0 }
 0x286   :  { %v3738_v6 = vpop.f32.mrf.mxu1  ;;  %v3696_v25 = vadd.f32 %v3695_v1, %v3653_v4  ;;  %v3737_v42 = vadd.f32 %v3736_v2, %v3694_v35 }
 0x287   :  { %v3697_v55 = vpop.f32.mrf.mxu0 }
 0x288   :  { %v3740_v11 = vpop.f32.mrf.mxu1  ;;  %v3698_v26 = vadd.f32 %v3697_v55, %v3655_v17  ;;  %v3739_v31 = vadd.f32 %v3738_v6, %v3696_v25  ;;  %v4828_v55 = vld [vmem:[#allocation9] ss:$0 sm:$0xff] }
 0x28a   :  { %v3741_v34 = vadd.f32 %v3740_v11, %v3698_v26 }
 0x2c1   :  { %v3777_v61 = vpop.f32.mrf.mxu0 }
 0x2c2   :  { %v3820_v18 = vpop.f32.mrf.mxu1  ;;  %v3778_v14 = vadd.f32 %v3777_v61, %v3735_v27 }
 0x2c3   :  { %v3779_v50 = vpop.f32.mrf.mxu0 }
 0x2c4   :  { %v3822_v24 = vpop.f32.mrf.mxu1  ;;  %v3780_v30 = vadd.f32 %v3779_v50, %v3737_v42  ;;  %v3821_v22 = vadd.f32 %v3820_v18, %v3778_v14 }
 0x2c5   :  { %v3781_v5 = vpop.f32.mrf.mxu0 }
 0x2c6   :  { %v3824_v9 = vpop.f32.mrf.mxu1  ;;  %v3782_v36 = vadd.f32 %v3781_v5, %v3739_v31  ;;  %v3823_v46 = vadd.f32 %v3822_v24, %v3780_v30 }
 0x2c7   :  { %v3783_v12 = vpop.f32.mrf.mxu0 }
 0x2c8   :  { %v3826_v33 = vpop.f32.mrf.mxu1  ;;  %v3784_v38 = vadd.f32 %v3783_v12, %v3741_v34  ;;  %v3825_v23 = vadd.f32 %v3824_v9, %v3782_v36 }
 0x2ca   :  { %v3827_v49 = vadd.f32 %v3826_v33, %v3784_v38 }
 0x301   :  { %v3863_v32 = vpop.f32.mrf.mxu0 }
 0x302   :  { %v3906_v37 = vpop.f32.mrf.mxu1  ;;  %v3864_v58 = vadd.f32 %v3863_v32, %v3821_v22 }
 0x303   :  { %v3865_v43 = vpop.f32.mrf.mxu0 }
 0x304   :  { %v3908_v39 = vpop.f32.mrf.mxu1  ;;  %v3866_v41 = vadd.f32 %v3865_v43, %v3823_v46  ;;  %v3907_v45 = vadd.f32 %v3906_v37, %v3864_v58 }
 0x305   :  { %v3867_v44 = vpop.f32.mrf.mxu0 }
 0x306   :  { %v3910_v48 = vpop.f32.mrf.mxu1  ;;  %v3868_v54 = vadd.f32 %v3867_v44, %v3825_v23  ;;  %v3909_v8 = vadd.f32 %v3908_v39, %v3866_v41  ;;  %v3917_v52 = vmax.f32 %v3907_v45, 0.0 }
 0x307   :  { %v3869_v13 = vpop.f32.mrf.mxu0 }
 0x308   :  { %v3911_v53 = vadd.f32 %v3910_v48, %v3868_v54  ;;  %v3870_v51 = vadd.f32 %v3869_v13, %v3827_v49  ;;  %v3912_v47 = vpop.f32.mrf.mxu1  ;;  %v3918_v57 = vmax.f32 %v3909_v8, 0.0 }
 0x30a   :  { %v3913_v28 = vadd.f32 %v3912_v47, %v3870_v51  ;;  %v3921_v29 = vmax.f32 %v3911_v53, 0.0 }
 0x30c   :  { %v3922_v60 = vmax.f32 %v3913_v28, 0.0  ;;  %v3925_v59 = vpack.c.bf16 %v3921_v29, %v3917_v52 }
 0x30e   :  { %v3926_v40 = vpack.c.bf16 %v3922_v60, %v3918_v57 }
 0x310   :  { %4256 = vmatprep.mubr.bf16.mxu1 %v3926_v40 }
 0x311   :  { %4257 = vmatmul.mubr.bf16.vlgmr.msra.gmra.mxu1 %v3925_v59 }
 0x321   :  { %v4845_v63 = vpop.f32.mrf.mxu0 }
 0x323   :  { %v4846_v2 = vpop.f32.mrf.mxu0 }
 0x324   :  { %v4847_v6 = vadd.f32 %v4846_v2, %v4845_v63 }
 0x325   :  { %v4848_v3 = vpop.f32.mrf.mxu0 }
 0x327   :  { %v4849_v10 = vpop.f32.mrf.mxu0 }
 0x328   :  { %v4850_v61 = vadd.f32 %v4849_v10, %v4848_v3 }
 0x3d1   :  { %v4867_v0 = vpop.f32.mrf.mxu1 }
 0x3d3   :  { %v4868_v1 = vpop.f32.mrf.mxu1 }
 0x3d4   :  { %v4869_v7 = vadd.f32 %v4868_v1, %v4867_v0 }
 0x3d5   :  { %v4870_v11 = vpop.f32.mrf.mxu1 }
 0x3d6   :  { %v4259_v15 = vadd.f32 %v4869_v7, %v4847_v6 }
 0x3d7   :  { %v4871_v16 = vpop.f32.mrf.mxu1 }
 0x3d8   :  { %v4272_v18 = vadd.f32 %v4828_v55, %v4259_v15  ;;  %v4872_v19 = vadd.f32 %v4871_v16, %v4870_v11 }
 0x3da   :  { %4275 = vst.msk [vmem:[%s6002_s5] sm:$0xff] %vm4274_vm0, %v4272_v18  ;;  %v4262_v20 = vadd.f32 %v4872_v19, %v4850_v61 }
 0x3dc   :  { %v4273_v21 = vadd.f32 %v4828_v55, %v4262_v20 }
 0x3de   :  { %4276 = vst.msk [vmem:[%s6002_s5 + $0x8] sm:$0xff] %vm4274_vm0, %v4273_v21 }
 0x3df   :  { %4281 = vsyncpa [#allocation3], 1 }
 0x3e0   :  { %4282 = vsyncpa [#allocation5], 1 }
 0x3e1   :  { %4283 = vsyncpa [#allocation8], 1 }

</bundles_post_ra>
